<compile_context>
chip_gen: v7x
topology: tpu7x:2x2x1
jax: 0.10.0
libtpu: 0.0.40
codegen_flags: <defaults>
</compile_context>

<pallas_src>
import math

import jax
import jax.numpy as jnp
from jax.experimental import pallas as pl
from jax.experimental.pallas import tpu as pltpu

LEAKY_SLOPE = 0.2
BN_EPS = 0.8  # nn.BatchNorm1d(out_feat, 0.8) -> second positional arg is eps


# ---------------------------------------------------------------------------
# Packed per-feature vector layout (biases + BN gamma/beta of the hidden stack)
# All offsets are multiples of 128 -> static, lane-tile-aligned slices in VMEM.
# ---------------------------------------------------------------------------
def _vec_offsets():
    offs, o = {}, 0
    offs["b1"] = (o, 128); o += 128
    for li, d in ((2, 256), (3, 512), (4, 1024)):
        offs[f"b{li}"] = (o, d); o += d
        offs[f"g{li}"] = (o, d); o += d
        offs[f"bt{li}"] = (o, d); o += d
    return offs, o


_VEC_OFFS, _VEC_LEN = _vec_offsets()  # _VEC_LEN == 5504 (43 * 128)


def _leaky(x):
    return jnp.where(x > 0, x, LEAKY_SLOPE * x)


def _sl(vec_ref, name):
    o, n = _VEC_OFFS[name]
    return vec_ref[:, o:o + n]


# ---------------------------------------------------------------------------
# Kernel 1: fused hidden stack  z -> (B, 1024)
# ---------------------------------------------------------------------------
def hidden_stack_kernel(z_ref, w1_ref, w2_ref, w3_ref, w4_ref, vec_ref, h_ref):
    # Layer 1: f32 Linear + LeakyReLU (no BatchNorm).
    h = jnp.dot(z_ref[...], w1_ref[...], preferred_element_type=jnp.float32)
    h = _leaky(h + _sl(vec_ref, "b1"))

    def bn_block(h, w_ref, bname, gname, btname):
        # bf16 MXU inputs, f32 accumulation; elementwise math stays f32.
        y = jnp.dot(h.astype(jnp.bfloat16), w_ref[...],
                    preferred_element_type=jnp.float32)
        y = y + _sl(vec_ref, bname)
        # PyTorch BatchNorm1d training mode: biased batch statistics.
        mean = jnp.mean(y, axis=0, keepdims=True)
        var = jnp.mean((y - mean) ** 2, axis=0, keepdims=True)
        y = (y - mean) * jax.lax.rsqrt(var + BN_EPS)
        y = y * _sl(vec_ref, gname) + _sl(vec_ref, btname)
        return _leaky(y)

    h = bn_block(h, w2_ref, "b2", "g2", "bt2")
    h = bn_block(h, w3_ref, "b3", "g3", "bt3")
    h = bn_block(h, w4_ref, "b4", "g4", "bt4")
    h_ref[...] = h


# ---------------------------------------------------------------------------
# Kernel 2: final Linear(1024, flat_pad) + tanh, column-tiled over flat_pad.
# ---------------------------------------------------------------------------
def final_layer_kernel(h_ref, w5_ref, b5_ref, out_ref):
    y = jnp.dot(h_ref[...].astype(jnp.bfloat16), w5_ref[...],
                preferred_element_type=jnp.float32) + b5_ref[...]
    out_ref[...] = jnp.tanh(y)


# ---------------------------------------------------------------------------
# Parameters (PyTorch-style U(-1/sqrt(fan_in), 1/sqrt(fan_in)) init)
# ---------------------------------------------------------------------------
def init_params(key, latent_dim, img_shape):
    flat = img_shape[0] * img_shape[1] * img_shape[2]
    flat_pad = pl.cdiv(flat, 128) * 128
    dims = [(latent_dim, 128), (128, 256), (256, 512), (512, 1024), (1024, flat)]

    raw = []
    for fin, fout in dims:
        key, kw, kb = jax.random.split(key, 3)
        bound = 1.0 / math.sqrt(fin)
        w = jax.random.uniform(kw, (fin, fout), jnp.float32, -bound, bound)
        b = jax.random.uniform(kb, (fout,), jnp.float32, -bound, bound)
        raw.append((w, b))

    (w1, b1), (w2, b2), (w3, b3), (w4, b4), (w5, b5) = raw

    # Pack the hidden-stack per-feature vectors into one lane-aligned slab.
    vec_parts = [b1]
    for b, d in ((b2, 256), (b3, 512), (b4, 1024)):
        vec_parts += [b, jnp.ones((d,), jnp.float32), jnp.zeros((d,), jnp.float32)]
    vec = jnp.concatenate(vec_parts)[None, :]
    assert vec.shape[1] == _VEC_LEN

    # Pad the final-layer output dim to a multiple of 128 (lane-dense stores);
    # the padding columns are zero and get sliced off after the call.
    if flat_pad != flat:
        w5 = jnp.pad(w5, ((0, 0), (0, flat_pad - flat)))
        b5 = jnp.pad(b5, (0, flat_pad - flat))

    return dict(
        w1=w1,                               # f32 latent projection (tiny)
        w2=w2.astype(jnp.bfloat16),
        w3=w3.astype(jnp.bfloat16),
        w4=w4.astype(jnp.bfloat16),
        w5=w5.astype(jnp.bfloat16),
        vec=vec,                             # (1, 5504) f32
        b5=b5[None, :].astype(jnp.float32),  # (1, flat_pad) f32
    )


def _nbytes(*arrs):
    return int(sum(a.size * a.dtype.itemsize for a in arrs))


def _vmem_limit(bytes_needed, floor=8 << 20, cap=32 << 20):
    # Size to real need (with headroom already folded into bytes_needed),
    # never request the whole physical VMEM of the chip.
    return int(min(cap, max(floor, bytes_needed)))


# ---------------------------------------------------------------------------
# Forward pass
# ---------------------------------------------------------------------------
def generator_forward(z, params, img_shape):
    B, latent_dim = z.shape
    flat = img_shape[0] * img_shape[1] * img_shape[2]
    w1, w2, w3, w4, w5 = (params["w1"], params["w2"], params["w3"],
                          params["w4"], params["w5"])
    vec, b5 = params["vec"], params["b5"]
    flat_pad = w5.shape[1]

    vmem = pl.BlockSpec(memory_space=pltpu.MemorySpace.VMEM)

    # --- call 1: fused hidden stack (weights total ~1.4 MiB) ---------------
    hidden_bytes = _nbytes(z, w1, w2, w3, w4, vec) + B * 1024 * 4
    cost1 = pl.CostEstimate(
        flops=2 * B * (latent_dim * 128 + 128 * 256 + 256 * 512 + 512 * 1024),
        transcendentals=256 + 512 + 1024,          # BN rsqrt per feature
        bytes_accessed=hidden_bytes)
    h = pl.pallas_call(
        hidden_stack_kernel,
        out_shape=jax.ShapeDtypeStruct((B, 1024), jnp.float32),
        in_specs=[vmem] * 6,
        out_specs=vmem,
        compiler_params=pltpu.CompilerParams(
            vmem_limit_bytes=_vmem_limit(2 * hidden_bytes)),
        cost_estimate=cost1,
    )(z, w1, w2, w3, w4, vec)

    # --- call 2: final Linear + tanh, pipelined over output column tiles ---
    if flat_pad % 256 == 0 and flat_pad >= 512:
        TN = 256
    else:
        TN = 128
    grid = (flat_pad // TN,)
    step_bytes = B * 1024 * 4 + 1024 * TN * 2 + TN * 4 + B * TN * 4
    cost2 = pl.CostEstimate(
        flops=2 * B * 1024 * flat_pad,
        transcendentals=B * flat_pad,              # tanh
        bytes_accessed=_nbytes(h, w5, b5) + B * flat_pad * 4)
    out_flat = pl.pallas_call(
        final_layer_kernel,
        out_shape=jax.ShapeDtypeStruct((B, flat_pad), jnp.float32),
        grid=grid,
        in_specs=[
            pl.BlockSpec((B, 1024), lambda j: (0, 0)),   # h: invariant block
            pl.BlockSpec((1024, TN), lambda j: (0, j)),  # W5 column tile
            pl.BlockSpec((1, TN), lambda j: (0, j)),     # b5 column tile
        ],
        out_specs=pl.BlockSpec((B, TN), lambda j: (0, j)),
        compiler_params=pltpu.CompilerParams(
            dimension_semantics=("parallel",),
            vmem_limit_bytes=_vmem_limit(4 * step_bytes)),
        cost_estimate=cost2,
    )(h, w5, b5)

    # Drop the lane padding and reshape exactly like img.view(B, C, H, W).
    return out_flat[:, :flat].reshape(B, *img_shape)


# ---------------------------------------------------------------------------
# Pure-JAX reference (same dtypes/ops) for a correctness check.
# ---------------------------------------------------------------------------
def generator_reference(z, params, img_shape):
    w1, w2, w3, w4, w5 = (params["w1"], params["w2"], params["w3"],
                          params["w4"], params["w5"])
    vec, b5 = params["vec"], params["b5"]

    def sl(name):
        o, n = _VEC_OFFS[name]
        return vec[:, o:o + n]

    h = jnp.dot(z, w1, preferred_element_type=jnp.float32) + sl("b1")
    h = _leaky(h)
    for li, w in ((2, w2), (3, w3), (4, w4)):
        y = jnp.dot(h.astype(jnp.bfloat16), w,
                    preferred_element_type=jnp.float32) + sl(f"b{li}")
        m = jnp.mean(y, axis=0, keepdims=True)
        v = jnp.mean((y - m) ** 2, axis=0, keepdims=True)
        y = (y - m) * jax.lax.rsqrt(v + BN_EPS)
        y = y * sl(f"g{li}") + sl(f"bt{li}")
        h = _leaky(y)
    y = jnp.dot(h.astype(jnp.bfloat16), w5,
                preferred_element_type=jnp.float32) + b5
    out = jnp.tanh(y)
    flat = img_shape[0] * img_shape[1] * img_shape[2]
    return out[:, :flat].reshape(z.shape[0], *img_shape)


if __name__ == "__main__":
    # Small shapes consistent with the module: latent_dim=64, channels=1, img_size=16.
    # NOTE: for real throughput, batch toward 128-256 so the MXU rows are filled;
    # BatchNorm statistics are computed over whatever batch the kernel sees.
    batch = 8
    latent_dim = 64
    img_shape = (1, 16, 16)

    key = jax.random.PRNGKey(0)
    key, kz = jax.random.split(key)
    z = jax.random.normal(kz, (batch, latent_dim), jnp.float32)

    params = init_params(key, latent_dim, img_shape)

    img = generator_forward(z, params, img_shape)
    jax.block_until_ready(img)

    assert img.shape == (batch, *img_shape), img.shape
    assert bool(jnp.all(jnp.isfinite(img)))

    ref = generator_reference(z, params, img_shape)
    assert bool(jnp.allclose(img, ref, atol=1e-2, rtol=1e-2))

    print("KERNEL_OK")
</pallas_src>

<mosaic_0001>
module attributes {stable_mosaic.version = 11 : i64} {
  func.func @hidden_stack_kernel(%arg0: memref<8x64xf32, #tpu.memory_space<vmem>>, %arg1: memref<64x128xf32, #tpu.memory_space<vmem>>, %arg2: memref<128x256xbf16, #tpu.memory_space<vmem>>, %arg3: memref<256x512xbf16, #tpu.memory_space<vmem>>, %arg4: memref<512x1024xbf16, #tpu.memory_space<vmem>>, %arg5: memref<1x5504xf32, #tpu.memory_space<vmem>>, %arg6: memref<8x1024xf32, #tpu.memory_space<vmem>>) attributes {dimension_semantics = [], scalar_prefetch = 0 : i64, scratch_operands = 0 : i64, tpu.core_type = #tpu.core_type<tc>} {
    %c0 = arith.constant 0 : index
    %c0_0 = arith.constant 0 : index
    %0 = vector.load %arg0[%c0, %c0_0] : memref<8x64xf32, #tpu.memory_space<vmem>>, vector<8x64xf32>
    %c0_1 = arith.constant 0 : index
    %c0_2 = arith.constant 0 : index
    %1 = vector.load %arg1[%c0_1, %c0_2] : memref<64x128xf32, #tpu.memory_space<vmem>>, vector<64x128xf32>
    %cst = arith.constant dense<0.000000e+00> : vector<8x128xf32>
    %2 = tpu.matmul %0, %1, %cst {dimension_numbers = #tpu.dot_dimension_numbers<[1], [0], [0], [1], [0, 0, 1, 1], [], []>} : vector<8x64xf32>, vector<64x128xf32>, vector<8x128xf32> -> vector<8x128xf32>
    %c0_3 = arith.constant 0 : index
    %c0_4 = arith.constant 0 : index
    %3 = vector.load %arg5[%c0_3, %c0_4] : memref<1x5504xf32, #tpu.memory_space<vmem>>, vector<1x128xf32>
    %4 = vector.broadcast %3 : vector<1x128xf32> to vector<8x128xf32>
    %5 = arith.addf %2, %4 : vector<8x128xf32>
    %cst_5 = arith.constant 0.000000e+00 : f32
    %6 = vector.broadcast %cst_5 : f32 to vector<8x128xf32>
    %7 = arith.cmpf ogt, %5, %6 : vector<8x128xf32>
    %cst_6 = arith.constant 2.000000e-01 : f32
    %8 = vector.broadcast %cst_6 : f32 to vector<8x128xf32>
    %9 = arith.mulf %8, %5 : vector<8x128xf32>
    %10 = arith.select %7, %5, %9 : vector<8x128xi1>, vector<8x128xf32>
    %11 = arith.truncf %10 : vector<8x128xf32> to vector<8x128xbf16>
    %c0_7 = arith.constant 0 : index
    %c0_8 = arith.constant 0 : index
    %12 = vector.load %arg2[%c0_7, %c0_8] : memref<128x256xbf16, #tpu.memory_space<vmem>>, vector<128x256xbf16>
    %cst_9 = arith.constant dense<0.000000e+00> : vector<8x256xf32>
    %13 = tpu.matmul %11, %12, %cst_9 {dimension_numbers = #tpu.dot_dimension_numbers<[1], [0], [0], [1], [0, 0, 1, 1], [], []>} : vector<8x128xbf16>, vector<128x256xbf16>, vector<8x256xf32> -> vector<8x256xf32>
    %c0_10 = arith.constant 0 : index
    %c128 = arith.constant 128 : index
    %14 = vector.load %arg5[%c0_10, %c128] : memref<1x5504xf32, #tpu.memory_space<vmem>>, vector<1x256xf32>
    %15 = vector.broadcast %14 : vector<1x256xf32> to vector<8x256xf32>
    %16 = arith.addf %13, %15 : vector<8x256xf32>
    %cst_11 = arith.constant dense<0.000000e+00> : vector<256xf32>
    %17 = vector.multi_reduction <add>, %16, %cst_11 [0] : vector<8x256xf32> to vector<256xf32>
    %18 = vector.shape_cast %17 : vector<256xf32> to vector<1x256xf32>
    %cst_12 = arith.constant 8.000000e+00 : f32
    %19 = vector.broadcast %cst_12 : f32 to vector<1x256xf32>
    %20 = arith.divf %18, %19 : vector<1x256xf32>
    %21 = vector.broadcast %20 : vector<1x256xf32> to vector<8x256xf32>
    %22 = arith.subf %16, %21 : vector<8x256xf32>
    %23 = arith.mulf %22, %22 : vector<8x256xf32>
    %cst_13 = arith.constant dense<0.000000e+00> : vector<256xf32>
    %24 = vector.multi_reduction <add>, %23, %cst_13 [0] : vector<8x256xf32> to vector<256xf32>
    %25 = vector.shape_cast %24 : vector<256xf32> to vector<1x256xf32>
    %cst_14 = arith.constant 8.000000e+00 : f32
    %26 = vector.broadcast %cst_14 : f32 to vector<1x256xf32>
    %27 = arith.divf %25, %26 : vector<1x256xf32>
    %28 = vector.broadcast %20 : vector<1x256xf32> to vector<8x256xf32>
    %29 = arith.subf %16, %28 : vector<8x256xf32>
    %cst_15 = arith.constant 8.000000e-01 : f32
    %30 = vector.broadcast %cst_15 : f32 to vector<1x256xf32>
    %31 = arith.addf %27, %30 : vector<1x256xf32>
    %32 = math.rsqrt %31 : vector<1x256xf32>
    %33 = vector.broadcast %32 : vector<1x256xf32> to vector<8x256xf32>
    %34 = arith.mulf %29, %33 : vector<8x256xf32>
    %c0_16 = arith.constant 0 : index
    %c384 = arith.constant 384 : index
    %35 = vector.load %arg5[%c0_16, %c384] : memref<1x5504xf32, #tpu.memory_space<vmem>>, vector<1x256xf32>
    %36 = vector.broadcast %35 : vector<1x256xf32> to vector<8x256xf32>
    %37 = arith.mulf %34, %36 : vector<8x256xf32>
    %c0_17 = arith.constant 0 : index
    %c640 = arith.constant 640 : index
    %38 = vector.load %arg5[%c0_17, %c640] : memref<1x5504xf32, #tpu.memory_space<vmem>>, vector<1x256xf32>
    %39 = vector.broadcast %38 : vector<1x256xf32> to vector<8x256xf32>
    %40 = arith.addf %37, %39 : vector<8x256xf32>
    %cst_18 = arith.constant 0.000000e+00 : f32
    %41 = vector.broadcast %cst_18 : f32 to vector<8x256xf32>
    %42 = arith.cmpf ogt, %40, %41 : vector<8x256xf32>
    %cst_19 = arith.constant 2.000000e-01 : f32
    %43 = vector.broadcast %cst_19 : f32 to vector<8x256xf32>
    %44 = arith.mulf %43, %40 : vector<8x256xf32>
    %45 = arith.select %42, %40, %44 : vector<8x256xi1>, vector<8x256xf32>
    %46 = arith.truncf %45 : vector<8x256xf32> to vector<8x256xbf16>
    %c0_20 = arith.constant 0 : index
    %c0_21 = arith.constant 0 : index
    %47 = vector.load %arg3[%c0_20, %c0_21] : memref<256x512xbf16, #tpu.memory_space<vmem>>, vector<256x512xbf16>
    %cst_22 = arith.constant dense<0.000000e+00> : vector<8x512xf32>
    %48 = tpu.matmul %46, %47, %cst_22 {dimension_numbers = #tpu.dot_dimension_numbers<[1], [0], [0], [1], [0, 0, 1, 1], [], []>} : vector<8x256xbf16>, vector<256x512xbf16>, vector<8x512xf32> -> vector<8x512xf32>
    %c0_23 = arith.constant 0 : index
    %c896 = arith.constant 896 : index
    %49 = vector.load %arg5[%c0_23, %c896] : memref<1x5504xf32, #tpu.memory_space<vmem>>, vector<1x512xf32>
    %50 = vector.broadcast %49 : vector<1x512xf32> to vector<8x512xf32>
    %51 = arith.addf %48, %50 : vector<8x512xf32>
    %cst_24 = arith.constant dense<0.000000e+00> : vector<512xf32>
    %52 = vector.multi_reduction <add>, %51, %cst_24 [0] : vector<8x512xf32> to vector<512xf32>
    %53 = vector.shape_cast %52 : vector<512xf32> to vector<1x512xf32>
    %cst_25 = arith.constant 8.000000e+00 : f32
    %54 = vector.broadcast %cst_25 : f32 to vector<1x512xf32>
    %55 = arith.divf %53, %54 : vector<1x512xf32>
    %56 = vector.broadcast %55 : vector<1x512xf32> to vector<8x512xf32>
    %57 = arith.subf %51, %56 : vector<8x512xf32>
    %58 = arith.mulf %57, %57 : vector<8x512xf32>
    %cst_26 = arith.constant dense<0.000000e+00> : vector<512xf32>
    %59 = vector.multi_reduction <add>, %58, %cst_26 [0] : vector<8x512xf32> to vector<512xf32>
    %60 = vector.shape_cast %59 : vector<512xf32> to vector<1x512xf32>
    %cst_27 = arith.constant 8.000000e+00 : f32
    %61 = vector.broadcast %cst_27 : f32 to vector<1x512xf32>
    %62 = arith.divf %60, %61 : vector<1x512xf32>
    %63 = vector.broadcast %55 : vector<1x512xf32> to vector<8x512xf32>
    %64 = arith.subf %51, %63 : vector<8x512xf32>
    %cst_28 = arith.constant 8.000000e-01 : f32
    %65 = vector.broadcast %cst_28 : f32 to vector<1x512xf32>
    %66 = arith.addf %62, %65 : vector<1x512xf32>
    %67 = math.rsqrt %66 : vector<1x512xf32>
    %68 = vector.broadcast %67 : vector<1x512xf32> to vector<8x512xf32>
    %69 = arith.mulf %64, %68 : vector<8x512xf32>
    %c0_29 = arith.constant 0 : index
    %c1408 = arith.constant 1408 : index
    %70 = vector.load %arg5[%c0_29, %c1408] : memref<1x5504xf32, #tpu.memory_space<vmem>>, vector<1x512xf32>
    %71 = vector.broadcast %70 : vector<1x512xf32> to vector<8x512xf32>
    %72 = arith.mulf %69, %71 : vector<8x512xf32>
    %c0_30 = arith.constant 0 : index
    %c1920 = arith.constant 1920 : index
    %73 = vector.load %arg5[%c0_30, %c1920] : memref<1x5504xf32, #tpu.memory_space<vmem>>, vector<1x512xf32>
    %74 = vector.broadcast %73 : vector<1x512xf32> to vector<8x512xf32>
    %75 = arith.addf %72, %74 : vector<8x512xf32>
    %cst_31 = arith.constant 0.000000e+00 : f32
    %76 = vector.broadcast %cst_31 : f32 to vector<8x512xf32>
    %77 = arith.cmpf ogt, %75, %76 : vector<8x512xf32>
    %cst_32 = arith.constant 2.000000e-01 : f32
    %78 = vector.broadcast %cst_32 : f32 to vector<8x512xf32>
    %79 = arith.mulf %78, %75 : vector<8x512xf32>
    %80 = arith.select %77, %75, %79 : vector<8x512xi1>, vector<8x512xf32>
    %81 = arith.truncf %80 : vector<8x512xf32> to vector<8x512xbf16>
    %c0_33 = arith.constant 0 : index
    %c0_34 = arith.constant 0 : index
    %82 = vector.load %arg4[%c0_33, %c0_34] : memref<512x1024xbf16, #tpu.memory_space<vmem>>, vector<512x1024xbf16>
    %cst_35 = arith.constant dense<0.000000e+00> : vector<8x1024xf32>
    %83 = tpu.matmul %81, %82, %cst_35 {dimension_numbers = #tpu.dot_dimension_numbers<[1], [0], [0], [1], [0, 0, 1, 1], [], []>} : vector<8x512xbf16>, vector<512x1024xbf16>, vector<8x1024xf32> -> vector<8x1024xf32>
    %c0_36 = arith.constant 0 : index
    %c2432 = arith.constant 2432 : index
    %84 = vector.load %arg5[%c0_36, %c2432] : memref<1x5504xf32, #tpu.memory_space<vmem>>, vector<1x1024xf32>
    %85 = vector.broadcast %84 : vector<1x1024xf32> to vector<8x1024xf32>
    %86 = arith.addf %83, %85 : vector<8x1024xf32>
    %cst_37 = arith.constant dense<0.000000e+00> : vector<1024xf32>
    %87 = vector.multi_reduction <add>, %86, %cst_37 [0] : vector<8x1024xf32> to vector<1024xf32>
    %88 = vector.shape_cast %87 : vector<1024xf32> to vector<1x1024xf32>
    %cst_38 = arith.constant 8.000000e+00 : f32
    %89 = vector.broadcast %cst_38 : f32 to vector<1x1024xf32>
    %90 = arith.divf %88, %89 : vector<1x1024xf32>
    %91 = vector.broadcast %90 : vector<1x1024xf32> to vector<8x1024xf32>
    %92 = arith.subf %86, %91 : vector<8x1024xf32>
    %93 = arith.mulf %92, %92 : vector<8x1024xf32>
    %cst_39 = arith.constant dense<0.000000e+00> : vector<1024xf32>
    %94 = vector.multi_reduction <add>, %93, %cst_39 [0] : vector<8x1024xf32> to vector<1024xf32>
    %95 = vector.shape_cast %94 : vector<1024xf32> to vector<1x1024xf32>
    %cst_40 = arith.constant 8.000000e+00 : f32
    %96 = vector.broadcast %cst_40 : f32 to vector<1x1024xf32>
    %97 = arith.divf %95, %96 : vector<1x1024xf32>
    %98 = vector.broadcast %90 : vector<1x1024xf32> to vector<8x1024xf32>
    %99 = arith.subf %86, %98 : vector<8x1024xf32>
    %cst_41 = arith.constant 8.000000e-01 : f32
    %100 = vector.broadcast %cst_41 : f32 to vector<1x1024xf32>
    %101 = arith.addf %97, %100 : vector<1x1024xf32>
    %102 = math.rsqrt %101 : vector<1x1024xf32>
    %103 = vector.broadcast %102 : vector<1x1024xf32> to vector<8x1024xf32>
    %104 = arith.mulf %99, %103 : vector<8x1024xf32>
    %c0_42 = arith.constant 0 : index
    %c3456 = arith.constant 3456 : index
    %105 = vector.load %arg5[%c0_42, %c3456] : memref<1x5504xf32, #tpu.memory_space<vmem>>, vector<1x1024xf32>
    %106 = vector.broadcast %105 : vector<1x1024xf32> to vector<8x1024xf32>
    %107 = arith.mulf %104, %106 : vector<8x1024xf32>
    %c0_43 = arith.constant 0 : index
    %c4480 = arith.constant 4480 : index
    %108 = vector.load %arg5[%c0_43, %c4480] : memref<1x5504xf32, #tpu.memory_space<vmem>>, vector<1x1024xf32>
    %109 = vector.broadcast %108 : vector<1x1024xf32> to vector<8x1024xf32>
    %110 = arith.addf %107, %109 : vector<8x1024xf32>
    %cst_44 = arith.constant 0.000000e+00 : f32
    %111 = vector.broadcast %cst_44 : f32 to vector<8x1024xf32>
    %112 = arith.cmpf ogt, %110, %111 : vector<8x1024xf32>
    %cst_45 = arith.constant 2.000000e-01 : f32
    %113 = vector.broadcast %cst_45 : f32 to vector<8x1024xf32>
    %114 = arith.mulf %113, %110 : vector<8x1024xf32>
    %115 = arith.select %112, %110, %114 : vector<8x1024xi1>, vector<8x1024xf32>
    %c0_46 = arith.constant 0 : index
    %c0_47 = arith.constant 0 : index
    %116 = vector.load %arg6[%c0_46, %c0_47] : memref<8x1024xf32, #tpu.memory_space<vmem>>, vector<8x1024xf32>
    tpu.vector_store %arg6[%c0_46, %c0_47], %115 {strides = array<i32>} : memref<8x1024xf32, #tpu.memory_space<vmem>>, vector<8x1024xf32>,
    return
  }
}

</mosaic_0001>

<bundles_post_ra>
// kernel: tpu_custom_call.1
= control target key start
LH: loop header
LB: loop body
LE: loop exit
PB: predicated region body
PF: predicated region fallthrough
CT: control target
= control target key end

     0   :  { %11 = vsyncpa [#allocation3], 0  ;;  %s4312_s0 = inlined_call_operand.hbm [shape: f32[8,64], index: 0, kind: input, shape index: {}]   ;;  %s4313_s1 = inlined_call_operand.hbm [shape: f32[64,128], index: 1, kind: input, shape index: {}]   ;;  %s4314_s2 = inlined_call_operand.hbm [shape: bf16[128,256], index: 2, kind: input, shape index: {}]   ;;  %s4315_s3 = inlined_call_operand.hbm [shape: bf16[256,512], index: 3, kind: input, shape index: {}]   ;;  %s4316_s4 = inlined_call_operand.hbm [shape: bf16[512,1024], index: 4, kind: input, shape index: {}]   ;;  %s4317_s5 = inlined_call_operand.hbm [shape: f32[1,5504], index: 5, kind: input, shape index: {}]   ;;  %s4318_s6 = inlined_call_operand.hbm [shape: f32[8,1024], index: 6, kind: output, shape index: {}]  }
   0x1   :  { %12 = vsyncpa [#allocation6], 0 }
   0x2   :  { %13 = vsyncpa [#allocation9], 0 }
   0x3   :  { %14 = vsyncpa [#allocation12], 0 }
   0x4   :  { %15 = vsyncpa [#allocation4], 0  ;;  %s3992_s21 = smov [#allocation5]   ;;  %s3828_s25 = scalar_lea.hbm %s4313_s1, 1024 }
   0x5   :  { %s31_s22 = sshll.u32 %s3992_s21, 4  ;;  %p3829_p0 = scmp.ne.s32.totalorder %s4313_s1, %s3828_s25  ;;  %s32_s22 = int_to_ptr.vmem [resolvable:$true] %s31_s22 }
   0x6   :  { %p3832_p1 = scmp.lt.u32.totalorder %s3828_s25, %s4313_s1 }
   0x8   :  { %p3834_p2 = pnand %p3832_p1, %p3829_p0 }
   0xa   :  { %3837 = shalt.err (!%p3834_p2)
}
   0xb   :  { %s3838_s30 = scalar_lea.vmem %s32_s22, 1024  ;;  %p3843_p4 = scmp.lt.s32.totalorder %s32_s22, %s32_s22 }
   0xc   :  { %p3839_p3 = scmp.ne.s32.totalorder %s32_s22, %s3838_s30  ;;  %p3844_p5 = scmp.lt.s32.totalorder %s3838_s30, %s3838_s30 }
   0xe   :  { %p3845_p6 = por %p3844_p5, %p3843_p4 }
  0x10   :  { %p3846_p7 = pnand %p3845_p6, %p3839_p3 }
  0x12   :  { %3849 = shalt.err (!%p3846_p7)
}
  0x13   :  { %s3993_s7 = smov 128   ;;  %s3994_s8 = smov 8  }
  0x14   :  { %37 = dma.hbm_to_vmem [thread:$0]  %s4313_s1, 1024, %s32_s22, [#allocation6], %s3993_s7, %s3993_s7, %s3994_s8  }
  0x15   :  { %s3995_s11 = smov [#allocation8]   ;;  %s3850_s15 = scalar_lea.hbm %s4315_s3, 8192 }
  0x16   :  { %s55_s12 = sshll.u32 %s3995_s11, 4  ;;  %p3851_p8 = scmp.ne.s32.totalorder %s4315_s3, %s3850_s15  ;;  %s56_s12 = int_to_ptr.vmem [resolvable:$true] %s55_s12 }
  0x17   :  { %p3854_p9 = scmp.lt.u32.totalorder %s3850_s15, %s4315_s3 }
  0x19   :  { %p3856_p10 = pnand %p3854_p9, %p3851_p8 }
  0x1b   :  { %3859 = shalt.err (!%p3856_p10)
}
  0x1c   :  { %s3860_s20 = scalar_lea.vmem %s56_s12, 8192  ;;  %p3865_p12 = scmp.lt.s32.totalorder %s56_s12, %s56_s12 }
  0x1d   :  { %p3861_p11 = scmp.ne.s32.totalorder %s56_s12, %s3860_s20  ;;  %p3866_p13 = scmp.lt.s32.totalorder %s3860_s20, %s3860_s20 }
  0x1f   :  { %p3867_p0 = por %p3866_p13, %p3865_p12 }
  0x21   :  { %p3868_p1 = pnand %p3867_p0, %p3861_p11 }
  0x23   :  { %3871 = shalt.err (!%p3868_p1)
}
  0x24   :  { %s3996_s1 = smov 256   ;;  %s3997_s21 = smov 16  }
  0x25   :  { %61 = dma.hbm_to_vmem [thread:$0]  %s4315_s3, 8192, %s56_s12, [#allocation9], %s3996_s1, %s3996_s1, %s3997_s21  }
  0x26   :  { %s3998_s24 = smov [#allocation2]   ;;  %s3999_s26 = smov [#allocation7]  }
  0x27   :  { %s22_s25 = sshll.u32 %s3998_s24, 4  ;;  %s43_s27 = sshll.u32 %s3999_s26, 4  ;;  %s23_s25 = int_to_ptr.vmem [resolvable:$true] %s22_s25  ;;  %s4071_s27 = int_to_ptr.vmem [resolvable:$true] %s43_s27 }
  0x28   :  { %s3872_s30 = scalar_lea.hbm %s4312_s0, 128 }
  0x29   :  { %p3873_p2 = scmp.ne.s32.totalorder %s4312_s0, %s3872_s30  ;;  %p3876_p3 = scmp.lt.u32.totalorder %s3872_s30, %s4312_s0 }
  0x2b   :  { %p3878_p4 = pnand %p3876_p3, %p3873_p2 }
  0x2d   :  { %3881 = shalt.err (!%p3878_p4)
}
  0x2e   :  { %s3882_s3 = scalar_lea.vmem %s23_s25, 128  ;;  %p3887_p6 = scmp.lt.s32.totalorder %s23_s25, %s23_s25 }
  0x2f   :  { %p3883_p5 = scmp.ne.s32.totalorder %s23_s25, %s3882_s3  ;;  %p3888_p7 = scmp.lt.s32.totalorder %s3882_s3, %s3882_s3 }
  0x31   :  { %p3889_p8 = por %p3888_p7, %p3887_p6 }
  0x33   :  { %p3890_p9 = pnand %p3889_p8, %p3883_p5 }
  0x35   :  { %3893 = shalt.err (!%p3890_p9)
}
  0x36   :  { %25 = dma.hbm_to_vmem [thread:$0]  %s4312_s0, 128, %s23_s25, [#allocation3]  }
  0x37   :  { %s3894_s17 = scalar_lea.hbm %s4314_s2, 2048 }
  0x38   :  { %p3895_p10 = scmp.ne.s32.totalorder %s4314_s2, %s3894_s17  ;;  %p3898_p11 = scmp.lt.u32.totalorder %s3894_s17, %s4314_s2 }
  0x3a   :  { %p3900_p12 = pnand %p3898_p11, %p3895_p10 }
  0x3c   :  { %3903 = shalt.err (!%p3900_p12)
}
  0x3d   :  { %s3904_s21 = scalar_lea.vmem %s4071_s27, 2048  ;;  %p3909_p0 = scmp.lt.s32.totalorder %s4071_s27, %s4071_s27 }
  0x3e   :  { %p3905_p13 = scmp.ne.s32.totalorder %s4071_s27, %s3904_s21  ;;  %p3910_p1 = scmp.lt.s32.totalorder %s3904_s21, %s3904_s21 }
  0x40   :  { %p3911_p2 = por %p3910_p1, %p3909_p0 }
  0x42   :  { %p3912_p3 = pnand %p3911_p2, %p3905_p13 }
  0x44   :  { %3915 = shalt.err (!%p3912_p3)
}
  0x45   :  { %49 = dma.hbm_to_vmem [thread:$0]  %s4314_s2, 2048, %s4071_s27, [#allocation6], %s3993_s7, %s3993_s7, %s3994_s8  }
  0x46   :  { %s4000_s23 = smov [#allocation10]   ;;  %s3916_s28 = scalar_lea.hbm %s4316_s4, 32768 }
  0x47   :  { %s67_s24 = sshll.u32 %s4000_s23, 4  ;;  %p3917_p4 = scmp.ne.s32.totalorder %s4316_s4, %s3916_s28  ;;  %s68_s24 = int_to_ptr.vmem [resolvable:$true] %s67_s24 }
  0x48   :  { %p3920_p5 = scmp.lt.u32.totalorder %s3916_s28, %s4316_s4 }
  0x4a   :  { %p3922_p6 = pnand %p3920_p5, %p3917_p4 }
  0x4c   :  { %3925 = shalt.err (!%p3922_p6)
}
  0x4d   :  { %s3926_s11 = scalar_lea.vmem %s68_s24, 32768  ;;  %p3931_p8 = scmp.lt.s32.totalorder %s68_s24, %s68_s24 }
  0x4e   :  { %p3927_p7 = scmp.ne.s32.totalorder %s68_s24, %s3926_s11  ;;  %p3932_p9 = scmp.lt.s32.totalorder %s3926_s11, %s3926_s11 }
  0x50   :  { %p3933_p10 = por %p3932_p9, %p3931_p8 }
  0x52   :  { %p3934_p11 = pnand %p3933_p10, %p3927_p7 }
  0x54   :  { %3937 = shalt.err (!%p3934_p11)
}
  0x55   :  { %s4001_s2 = smov 512   ;;  %s4002_s7 = smov 32  }
  0x56   :  { %73 = dma.hbm_to_vmem [thread:$0]  %s4316_s4, 32768, %s68_s24, [#allocation9], %s4001_s2, %s4001_s2, %s4002_s7  }
  0x57   :  { %s4003_s13 = smov [#allocation11]   ;;  %s3938_s15 = scalar_lea.hbm %s4317_s5, 688 }
  0x58   :  { %s80_s3 = sshll.u32 %s4003_s13, 4  ;;  %p3939_p12 = scmp.ne.s32.totalorder %s4317_s5, %s3938_s15  ;;  %s81_s3 = int_to_ptr.vmem [resolvable:$true] %s80_s3 }
  0x59   :  { %p3942_p13 = scmp.lt.u32.totalorder %s3938_s15, %s4317_s5 }
  0x5b   :  { %p3944_p0 = pnand %p3942_p13, %p3939_p12 }
  0x5d   :  { %3947 = shalt.err (!%p3944_p0)
}
  0x5e   :  { %s3948_s20 = scalar_lea.vmem %s81_s3, 688  ;;  %s3952_s4 = scalar_lea.vmem %s81_s3, 704 }
  0x5f   :  { %p3949_p1 = scmp.ne.s32.totalorder %s81_s3, %s3948_s20  ;;  %p3953_p2 = scmp.lt.s32.totalorder %s81_s3, %s81_s3 }
  0x60   :  { %p3954_p3 = scmp.lt.s32.totalorder %s3952_s4, %s3948_s20 }
  0x62   :  { %p3955_p4 = por %p3954_p3, %p3953_p2 }
  0x64   :  { %p3956_p5 = pnand %p3955_p4, %p3949_p1 }
  0x66   :  { %3959 = shalt.err (!%p3956_p5)
}
  0x67   :  { %83 = dma.hbm_to_vmem [thread:$0]  %s4317_s5, 688, %s81_s3, [#allocation12]  }
  0x68   :  { %3982 = dma.done.wait [#allocation3], 128  }
  0x69   :  { %3983 = vsyncadd [#allocation3], 4294967168 }
  0x6a   :  { %3984 = dma.done.wait [#allocation6], 3072  }
  0x6b   :  { %3985 = vsyncadd [#allocation6], 4294964224 }
  0x6c   :  { %3986 = dma.done.wait [#allocation9], 40960  }
  0x6d   :  { %3987 = vsyncadd [#allocation9], 4294926336 }
  0x6e   :  { %3988 = dma.done.wait [#allocation12], 688  }
  0x6f   :  { %3989 = vsyncadd [#allocation12], 4294966608  ;;  %v4004_v0 = vmov 0.0|0.0   ;;  %vm4005_vm0 = vmmov 0   ;;  %v4006_v1 = vmov 0.0   ;;  %v104_v2 = vld [vmem:[#allocation5] sm:$0xff] }
  0x70   :  { %3627 = vmatprep.subr.bf16.mxu0 %v4004_v0  ;;  %3624 = vmatprep.mubr.msk.f32.mxu0 %vm4005_vm0, %v4006_v1  ;;  %v105_v3 = vld [vmem:[#allocation5 + $0x8] sm:$0xff]  ;;  %v106_v4 = vld [vmem:[#allocation5 + $0x10] sm:$0xff]  ;;  %v107_v6 = vld [vmem:[#allocation5 + $0x18] sm:$0xff]  ;;  %vm119_vm1 = vcmask 523264   ;;  %v4007_v31 = vmov 0   ;;  %s4008_s5 = smov [#allocation13]  }
  0x71   :  { %v3628_v5 = vpack.c.bf16 %v105_v3, %v104_v2  ;;  %v108_v7 = vld [vmem:[#allocation5 + $0x20] sm:$0xff]  ;;  %v109_v8 = vld [vmem:[#allocation5 + $0x28] sm:$0xff]  ;;  %v3631_v9 = vpack.c.bf16 %v107_v6, %v106_v4  ;;  %v3683_v12 = vld [vmem:[#allocation7 + $0x14] ss:$8 sps:$4 sm:$0xff]   ;;  %337 = vmatprep.mubr.bf16.mxu1 %v4007_v31  ;;  %s3249_s0 = sshll.u32 %s4008_s5, 4  ;;  %s3250_s0 = int_to_ptr.vmem [resolvable:$true] %s3249_s0 }
  0x72   :  { %v3680_v10 = vld [vmem:[#allocation7 + $0x4] ss:$8 sps:$4 sm:$0xff]   ;;  %v3682_v11 = vld [vmem:[#allocation7] ss:$8 sps:$4 sm:$0xff]   ;;  %v110_v13 = vld [vmem:[#allocation5 + $0x30] sm:$0xff]  ;;  %v3634_v15 = vpack.c.bf16 %v109_v8, %v108_v7  ;;  %s3960_s22 = scalar_lea.vmem %s3250_s0, 1024  ;;  %p3965_p7 = scmp.lt.s32.totalorder %s3250_s0, %s3250_s0 }
  0x73   :  { %3629 = vmatpush3.bf16.msra.mxu0 %v3628_v5  ;;  %305 = vmatprep.subr.bf16.mxu1 %v3680_v10  ;;  %v3685_v14 = vld [vmem:[#allocation7 + $0x10] ss:$8 sps:$4 sm:$0xff]   ;;  %v3686_v16 = vld [vmem:[#allocation7 + $0x24] ss:$8 sps:$4 sm:$0xff]   ;;  %v3688_v18 = vld [vmem:[#allocation7 + $0x20] ss:$8 sps:$4 sm:$0xff]   ;;  %p3961_p6 = scmp.ne.s32.totalorder %s3250_s0, %s3960_s22  ;;  %p3966_p8 = scmp.lt.s32.totalorder %s3960_s22, %s3960_s22 }
  0x74   :  { %3630 = vmatprep.subr.bf16.mxu0 %v4004_v0  ;;  %306 = vmatpush1.bf16.msra.mxu1 %v3682_v11  ;;  %v111_v17 = vld [vmem:[#allocation5 + $0x38] sm:$0xff]  ;;  %v3692_v23 = vld [vmem:[#allocation7 + $0x44] ss:$8 sps:$4 sm:$0xff]   ;;  %v3694_v24 = vld [vmem:[#allocation7 + $0x40] ss:$8 sps:$4 sm:$0xff]  }
  0x75   :  { %307 = vmatprep.subr.bf16.mxu1 %v3683_v12  ;;  %v3637_v19 = vpack.c.bf16 %v111_v17, %v110_v13  ;;  %v3689_v20 = vld [vmem:[#allocation7 + $0x34] ss:$8 sps:$4 sm:$0xff]   ;;  %v3691_v21 = vld [vmem:[#allocation7 + $0x30] ss:$8 sps:$4 sm:$0xff]   ;;  %v3698_v27 = vld [vmem:[#allocation7 + $0x64] ss:$8 sps:$4 sm:$0xff]   ;;  %p3967_p9 = por %p3966_p8, %p3965_p7 }
  0x76   :  { %v103_v22 = vld [vmem:[#allocation2] sm:$0xff]  ;;  %v3700_v28 = vld [vmem:[#allocation7 + $0x60] ss:$8 sps:$4 sm:$0xff]   ;;  %v3706_v33 = vld [vmem:[#allocation8 + $0x4] ss:$16 sps:$4 sm:$0xff]  }
  0x77   :  { %3632 = vmatpush3.bf16.msra.mxu0 %v3631_v9  ;;  %v3695_v25 = vld [vmem:[#allocation7 + $0x54] ss:$8 sps:$4 sm:$0xff]   ;;  %v3697_v26 = vld [vmem:[#allocation7 + $0x50] ss:$8 sps:$4 sm:$0xff]   ;;  %v3261_v35 = vld [vmem:[#allocation11] ss:$0 sm:$0xff]  ;;  %p3968_p10 = pnand %p3967_p9, %p3961_p6 }
  0x78   :  { %3633 = vmatprep.subr.bf16.mxu0 %v4004_v0  ;;  %308 = vmatpush1.bf16.msra.mxu1 %v3685_v14  ;;  %v3701_v29 = vld [vmem:[#allocation7 + $0x74] ss:$8 sps:$4 sm:$0xff]   ;;  %v3703_v30 = vld [vmem:[#allocation7 + $0x70] ss:$8 sps:$4 sm:$0xff]  }
  0x79   :  { %309 = vmatprep.subr.bf16.mxu1 %v3686_v16  ;;  %v3704_v32 = vld [vmem:[#allocation8] ss:$16 sps:$4 sm:$0xff]   ;;  %v3709_v34 = vld [vmem:[#allocation8 + $0xc] ss:$16 sps:$4 sm:$0xff]   ;;  %v3707_v41 = vld [vmem:[#allocation8 + $0x8] ss:$16 sps:$4 sm:$0xff]  }
  0x7a   :  { %v3712_v43 = vld [vmem:[#allocation8 + $0x24] ss:$16 sps:$4 sm:$0xff]   ;;  %v3715_v44 = vld [vmem:[#allocation8 + $0x2c] ss:$16 sps:$4 sm:$0xff]   ;;  %v3710_v45 = vld [vmem:[#allocation8 + $0x20] ss:$16 sps:$4 sm:$0xff]  }
  0x7b   :  { %3635 = vmatpush3.bf16.msra.mxu0 %v3634_v15  ;;  %v3713_v46 = vld [vmem:[#allocation8 + $0x28] ss:$16 sps:$4 sm:$0xff]   ;;  %v3718_v47 = vld [vmem:[#allocation8 + $0x44] ss:$16 sps:$4 sm:$0xff]   ;;  %v3721_v48 = vld [vmem:[#allocation8 + $0x4c] ss:$16 sps:$4 sm:$0xff]  }
  0x7c   :  { %3636 = vmatprep.subr.bf16.mxu0 %v4004_v0  ;;  %310 = vmatpush1.bf16.msra.mxu1 %v3688_v18  ;;  %v3716_v49 = vld [vmem:[#allocation8 + $0x40] ss:$16 sps:$4 sm:$0xff]   ;;  %v3719_v50 = vld [vmem:[#allocation8 + $0x48] ss:$16 sps:$4 sm:$0xff]   ;;  %v3724_v51 = vld [vmem:[#allocation8 + $0x64] ss:$16 sps:$4 sm:$0xff]  }
  0x7d   :  { %311 = vmatprep.subr.bf16.mxu1 %v3689_v20  ;;  %v3727_v52 = vld [vmem:[#allocation8 + $0x6c] ss:$16 sps:$4 sm:$0xff]   ;;  %v3722_v53 = vld [vmem:[#allocation8 + $0x60] ss:$16 sps:$4 sm:$0xff]   ;;  %v3725_v54 = vld [vmem:[#allocation8 + $0x68] ss:$16 sps:$4 sm:$0xff]  }
  0x7e   :  { %v3730_v55 = vld [vmem:[#allocation8 + $0x84] ss:$16 sps:$4 sm:$0xff]   ;;  %v3733_v56 = vld [vmem:[#allocation8 + $0x8c] ss:$16 sps:$4 sm:$0xff]   ;;  %v3728_v57 = vld [vmem:[#allocation8 + $0x80] ss:$16 sps:$4 sm:$0xff]  }
  0x7f   :  { %3638 = vmatpush3.bf16.msra.mxu0 %v3637_v19  ;;  %v3731_v58 = vld [vmem:[#allocation8 + $0x88] ss:$16 sps:$4 sm:$0xff]   ;;  %v3736_v59 = vld [vmem:[#allocation8 + $0xa4] ss:$16 sps:$4 sm:$0xff]   ;;  %v3739_v60 = vld [vmem:[#allocation8 + $0xac] ss:$16 sps:$4 sm:$0xff]  }
  0x80   :  { %312 = vmatpush1.bf16.msra.mxu1 %v3691_v21  ;;  %827 = vmatprep.subr.bf16.mxu0 %v3706_v33  ;;  %v3734_v61 = vld [vmem:[#allocation8 + $0xa0] ss:$16 sps:$4 sm:$0xff]   ;;  %v3737_v62 = vld [vmem:[#allocation8 + $0xa8] ss:$16 sps:$4 sm:$0xff]   ;;  %v3742_v63 = vld [vmem:[#allocation8 + $0xc4] ss:$16 sps:$4 sm:$0xff]  }
  0x81   :  { %313 = vmatprep.subr.bf16.mxu1 %v3692_v23  ;;  %v3745_v0 = vld [vmem:[#allocation8 + $0xcc] ss:$16 sps:$4 sm:$0xff]   ;;  %v3740_v1 = vld [vmem:[#allocation8 + $0xc0] ss:$16 sps:$4 sm:$0xff]   ;;  %v3743_v2 = vld [vmem:[#allocation8 + $0xc8] ss:$16 sps:$4 sm:$0xff]  }
  0x82   :  { %3625 = vmatmul.mubr.msk.f32.vlgmr.msra.gmra.mrb[0].mxu0 %vm119_vm1, %v103_v22  ;;  %v3748_v3 = vld [vmem:[#allocation8 + $0xe4] ss:$16 sps:$4 sm:$0xff]   ;;  %v3751_v4 = vld [vmem:[#allocation8 + $0xec] ss:$16 sps:$4 sm:$0xff]   ;;  %v3746_v5 = vld [vmem:[#allocation8 + $0xe0] ss:$16 sps:$4 sm:$0xff]  }
  0x83   :  { %828 = vmatpush1.bf16.msra.mxu0 %v3704_v32  ;;  %v3749_v6 = vld [vmem:[#allocation8 + $0xe8] ss:$16 sps:$4 sm:$0xff]   ;;  %v3754_v7 = vld [vmem:[#allocation8 + $0x104] ss:$16 sps:$4 sm:$0xff]   ;;  %v3757_v8 = vld [vmem:[#allocation8 + $0x10c] ss:$16 sps:$4 sm:$0xff]  }
  0x84   :  { %314 = vmatpush1.bf16.msra.mxu1 %v3694_v24  ;;  %829 = vmatprep.subr.bf16.mxu0 %v3712_v43  ;;  %v3752_v9 = vld [vmem:[#allocation8 + $0x100] ss:$16 sps:$4 sm:$0xff]   ;;  %v3755_v10 = vld [vmem:[#allocation8 + $0x108] ss:$16 sps:$4 sm:$0xff]   ;;  %v3760_v11 = vld [vmem:[#allocation8 + $0x124] ss:$16 sps:$4 sm:$0xff]  }
  0x85   :  { %315 = vmatprep.subr.bf16.mxu1 %v3695_v25  ;;  %v3763_v12 = vld [vmem:[#allocation8 + $0x12c] ss:$16 sps:$4 sm:$0xff]   ;;  %v3758_v13 = vld [vmem:[#allocation8 + $0x120] ss:$16 sps:$4 sm:$0xff]   ;;  %v3761_v14 = vld [vmem:[#allocation8 + $0x128] ss:$16 sps:$4 sm:$0xff]  }
  0x86   :  { %v3766_v15 = vld [vmem:[#allocation8 + $0x144] ss:$16 sps:$4 sm:$0xff]   ;;  %v3769_v16 = vld [vmem:[#allocation8 + $0x14c] ss:$16 sps:$4 sm:$0xff]   ;;  %v3764_v17 = vld [vmem:[#allocation8 + $0x140] ss:$16 sps:$4 sm:$0xff]  }
  0x87   :  { %830 = vmatpush1.bf16.msra.mxu0 %v3710_v45  ;;  %v3767_v18 = vld [vmem:[#allocation8 + $0x148] ss:$16 sps:$4 sm:$0xff]   ;;  %v3772_v19 = vld [vmem:[#allocation8 + $0x164] ss:$16 sps:$4 sm:$0xff]   ;;  %v3775_v20 = vld [vmem:[#allocation8 + $0x16c] ss:$16 sps:$4 sm:$0xff]  }
  0x88   :  { %316 = vmatpush1.bf16.msra.mxu1 %v3697_v26  ;;  %831 = vmatprep.subr.bf16.mxu0 %v3718_v47  ;;  %v3770_v21 = vld [vmem:[#allocation8 + $0x160] ss:$16 sps:$4 sm:$0xff]   ;;  %v3773_v22 = vld [vmem:[#allocation8 + $0x168] ss:$16 sps:$4 sm:$0xff]   ;;  %v3778_v23 = vld [vmem:[#allocation8 + $0x184] ss:$16 sps:$4 sm:$0xff]   ;;  %v215_v47 = vlaneseq }
  0x89   :  { %317 = vmatprep.subr.bf16.mxu1 %v3698_v27  ;;  %v3781_v24 = vld [vmem:[#allocation8 + $0x18c] ss:$16 sps:$4 sm:$0xff]   ;;  %v3776_v25 = vld [vmem:[#allocation8 + $0x180] ss:$16 sps:$4 sm:$0xff]   ;;  %v3779_v26 = vld [vmem:[#allocation8 + $0x188] ss:$16 sps:$4 sm:$0xff]  }
  0x8a   :  { %v3784_v27 = vld [vmem:[#allocation8 + $0x1a4] ss:$16 sps:$4 sm:$0xff]   ;;  %v3793_v32 = vld [vmem:[#allocation8 + $0x1cc] ss:$16 sps:$4 sm:$0xff]   ;;  %v3788_v33 = vld [vmem:[#allocation8 + $0x1c0] ss:$16 sps:$4 sm:$0xff]  }
  0x8b   :  { %832 = vmatpush1.bf16.msra.mxu0 %v3716_v49  ;;  %v3790_v31 = vld [vmem:[#allocation8 + $0x1c4] ss:$16 sps:$4 sm:$0xff]  }
  0x8c   :  { %318 = vmatpush1.bf16.msra.mxu1 %v3700_v28  ;;  %833 = vmatprep.subr.bf16.mxu0 %v3724_v51  ;;  %v3787_v28 = vld [vmem:[#allocation8 + $0x1ac] ss:$16 sps:$4 sm:$0xff]  }
  0x8d   :  { %319 = vmatprep.subr.bf16.mxu1 %v3701_v29  ;;  %v3782_v29 = vld [vmem:[#allocation8 + $0x1a0] ss:$16 sps:$4 sm:$0xff]  }
  0x8f   :  { %834 = vmatpush1.bf16.msra.mxu0 %v3722_v53 }
  0x90   :  { %320 = vmatpush1.bf16.msra.mxu1 %v3703_v30  ;;  %835 = vmatprep.subr.bf16.mxu0 %v3730_v55  ;;  %v3785_v30 = vld [vmem:[#allocation8 + $0x1a8] ss:$16 sps:$4 sm:$0xff]  }
  0x91   :  { %868 = vmatprep.subr.bf16.mxu1 %v3709_v34  ;;  %v3791_v34 = vld [vmem:[#allocation8 + $0x1c8] ss:$16 sps:$4 sm:$0xff]  }
  0x93   :  { %836 = vmatpush1.bf16.msra.mxu0 %v3728_v57 }
  0x94   :  { %837 = vmatprep.subr.bf16.mxu0 %v3736_v59 }
  0x97   :  { %838 = vmatpush1.bf16.msra.mxu0 %v3734_v61 }
  0x98   :  { %839 = vmatprep.subr.bf16.mxu0 %v3742_v63 }
  0x9b   :  { %840 = vmatpush1.bf16.msra.mxu0 %v3740_v1 }
  0x9c   :  { %841 = vmatprep.subr.bf16.mxu0 %v3748_v3 }
  0x9f   :  { %842 = vmatpush1.bf16.msra.mxu0 %v3746_v5 }
  0xa0   :  { %843 = vmatprep.subr.bf16.mxu0 %v3754_v7 }
  0xa3   :  { %844 = vmatpush1.bf16.msra.mxu0 %v3752_v9 }
  0xa4   :  { %845 = vmatprep.subr.bf16.mxu0 %v3760_v11 }
  0xa7   :  { %846 = vmatpush1.bf16.msra.mxu0 %v3758_v13 }
  0xa8   :  { %847 = vmatprep.subr.bf16.mxu0 %v3766_v15 }
  0xab   :  { %848 = vmatpush1.bf16.msra.mxu0 %v3764_v17 }
  0xac   :  { %849 = vmatprep.subr.bf16.mxu0 %v3772_v19 }
  0xaf   :  { %850 = vmatpush1.bf16.msra.mxu0 %v3770_v21 }
  0xb0   :  { %851 = vmatprep.subr.bf16.mxu0 %v3778_v23 }
  0xb3   :  { %852 = vmatpush1.bf16.msra.mxu0 %v3776_v25 }
  0xb4   :  { %853 = vmatprep.subr.bf16.mxu0 %v3784_v27 }
  0xb7   :  { %854 = vmatpush1.bf16.msra.mxu0 %v3782_v29 }
  0xb8   :  { %855 = vmatprep.subr.bf16.mxu0 %v3790_v31  ;;  %v399_v31 = vld [vmem:[#allocation11 + $0x5] sm:$0x3] }
  0xbb   :  { %856 = vmatpush1.bf16.msra.mxu0 %v3788_v33 }
 0x155   :  { %v189_v36 = vpop.f32.mrb[0].mxu0 }
 0x156   :  { %v190_v37 = vadd.f32 %v3261_v35, %v189_v36  ;;  %v3626_v38 = vpop.f32.mrb[1].mxu0  ;;  %v3796_v35 = vld [vmem:[#allocation8 + $0x1e4] ss:$16 sps:$4 sm:$0xff]   ;;  %v3799_v36 = vld [vmem:[#allocation8 + $0x1ec] ss:$16 sps:$4 sm:$0xff]  }
 0x157   :  { %v3797_v38 = vld [vmem:[#allocation8 + $0x1e8] ss:$16 sps:$4 sm:$0xff]   ;;  %857 = vmatprep.subr.bf16.mxu0 %v3796_v35 }
 0x158   :  { %vm193_vm2 = vcmp.gt.f32.partialorder %v190_v37, 0.0  ;;  %v194_v39 = vmul.f32 0.2, %v190_v37 }
 0x15a   :  { %v195_v40 = vsel %vm193_vm2, %v190_v37, %v194_v39  ;;  %v3794_v37 = vld [vmem:[#allocation8 + $0x1e0] ss:$16 sps:$4 sm:$0xff]  }
 0x15b   :  { %v196_v42 = vpack.c.bf16 %v195_v40, %v195_v40  ;;  %858 = vmatpush1.bf16.msra.mxu0 %v3794_v37  ;;  %v4129_v39 = vld [vmem:[#allocation10] sm:$0xff] }
 0x15c   :  { %v4131_v40 = vld [vmem:[#allocation10 + $0x20] sm:$0xff] }
 0x15d   :  { %338 = vmatmul.mubr.bf16.vlgmr.msra.gmra.mrb[0].mxu1 %v196_v42  ;;  %v3343_v42 = vcombine.low %v4129_v39, %v4131_v40  ;;  %v3344_v43 = vcombine.high %v4129_v39, %v4131_v40  ;;  %v1070_v39 = vld [vmem:[#allocation10 + $0x88] sm:$0xff] }
 0x15e   :  { %869 = vmatpush1.bf16.msra.mxu1 %v3707_v41  ;;  %v4133_v41 = vld [vmem:[#allocation10 + $0x8] sm:$0xff] }
 0x15f   :  { %870 = vmatprep.subr.bf16.mxu1 %v3715_v44  ;;  %v4139_v44 = vld [vmem:[#allocation10 + $0x28] sm:$0xff]  ;;  %2631 = vmatprep.subr.bf16.mxu0 %v3344_v43 }
 0x160   :  { %v3345_v45 = vcombine.low %v4133_v41, %v4139_v44 }
 0x162   :  { %871 = vmatpush1.bf16.msra.mxu1 %v3713_v46  ;;  %v3346_v46 = vcombine.high %v4133_v41, %v4139_v44 }
 0x163   :  { %872 = vmatprep.subr.bf16.mxu1 %v3721_v48  ;;  %v4145_v48 = vshrl.u32 %v215_v47, 7 }
 0x165   :  { %v4148_v49 = vsub.s32 0, %v4145_v48  ;;  %v4151_v51 = vsub.s32 1, %v4145_v48 }
 0x166   :  { %873 = vmatpush1.bf16.msra.mxu1 %v3719_v50  ;;  %v213_v50 = vld [vmem:[#allocation11 + $0x1] sm:$0x3] }
 0x167   :  { %874 = vmatprep.subr.bf16.mxu1 %v3727_v52  ;;  %v218_v52 = vrot.slane %v213_v50, %v4148_v49  ;;  %v222_v53 = vrot.slane %v213_v50, %v4151_v51  ;;  %v404_v37 = vrot.slane %v399_v31, %v4148_v49  ;;  %v408_v43 = vrot.slane %v399_v31, %v4151_v51  ;;  %v1102_v31 = vld [vmem:[#allocation10 + $0x188] sm:$0xff] }
 0x16a   :  { %875 = vmatpush1.bf16.msra.mxu1 %v3725_v54 }
 0x16b   :  { %876 = vmatprep.subr.bf16.mxu1 %v3733_v56 }
 0x16e   :  { %877 = vmatpush1.bf16.msra.mxu1 %v3731_v58 }
 0x16f   :  { %878 = vmatprep.subr.bf16.mxu1 %v3739_v60 }
 0x172   :  { %879 = vmatpush1.bf16.msra.mxu1 %v3737_v62 }
 0x173   :  { %880 = vmatprep.subr.bf16.mxu1 %v3745_v0 }
 0x176   :  { %881 = vmatpush1.bf16.msra.mxu1 %v3743_v2 }
 0x177   :  { %882 = vmatprep.subr.bf16.mxu1 %v3751_v4 }
 0x17a   :  { %883 = vmatpush1.bf16.msra.mxu1 %v3749_v6 }
 0x17b   :  { %884 = vmatprep.subr.bf16.mxu1 %v3757_v8 }
 0x17e   :  { %885 = vmatpush1.bf16.msra.mxu1 %v3755_v10 }
 0x17f   :  { %886 = vmatprep.subr.bf16.mxu1 %v3763_v12 }
 0x182   :  { %887 = vmatpush1.bf16.msra.mxu1 %v3761_v14 }
 0x183   :  { %888 = vmatprep.subr.bf16.mxu1 %v3769_v16 }
 0x186   :  { %889 = vmatpush1.bf16.msra.mxu1 %v3767_v18 }
 0x187   :  { %890 = vmatprep.subr.bf16.mxu1 %v3775_v20 }
 0x18a   :  { %891 = vmatpush1.bf16.msra.mxu1 %v3773_v22 }
 0x18b   :  { %892 = vmatprep.subr.bf16.mxu1 %v3781_v24 }
 0x18e   :  { %893 = vmatpush1.bf16.msra.mxu1 %v3779_v26 }
 0x18f   :  { %894 = vmatprep.subr.bf16.mxu1 %v3787_v28 }
 0x192   :  { %895 = vmatpush1.bf16.msra.mxu1 %v3785_v30  ;;  %v385_v30 = vld [vmem:[#allocation11 + $0x3] sm:$0x3] }
 0x193   :  { %896 = vmatprep.subr.bf16.mxu1 %v3793_v32  ;;  %v390_v32 = vrot.slane %v385_v30, %v4148_v49 }
 0x196   :  { %897 = vmatpush1.bf16.msra.mxu1 %v3791_v34  ;;  %v394_v34 = vrot.slane %v385_v30, %v4151_v51  ;;  %v1105_v30 = vld [vmem:[#allocation10 + $0x1a0] sm:$0xff] }
 0x197   :  { %898 = vmatprep.subr.bf16.mxu1 %v3799_v36 }
 0x19a   :  { %899 = vmatpush1.bf16.msra.mxu1 %v3797_v38 }
 0x19b   :  { %2713 = vmatprep.subr.bf16.mxu1 %v3346_v46 }
 0x230   :  { %v339_v54 = vpop.f32.mrb[0].mxu1 }
 0x231   :  { %v340_v55 = vadd.f32 %v339_v54, %v218_v52  ;;  %v341_v56 = vpop.f32.mrb[1].mxu1 }
 0x232   :  { %v342_v57 = vadd.f32 %v341_v56, %v222_v53  ;;  %v343_v58 = vpop.f32.mrb[2].mxu1 }
 0x233   :  { %v346_v59 = vrot.slane %v340_v55, 4  ;;  %v344_v60 = vpop.f32.mrb[3].mxu1 }
 0x234   :  { %v352_v61 = vrot.slane %v342_v57, 4  ;;  %v1065_v60 = vld [vmem:[#allocation10 + $0x60] sm:$0xff] }
 0x235   :  { %v347_v62 = vadd.f32 %v346_v59, %v340_v55  ;;  %v1061_v59 = vld [vmem:[#allocation10 + $0x40] sm:$0xff] }
 0x236   :  { %v353_v63 = vadd.f32 %v352_v61, %v342_v57  ;;  %v1062_v61 = vld [vmem:[#allocation10 + $0x48] sm:$0xff] }
 0x237   :  { %v348_v0 = vrot.slane %v347_v62, 2 }
 0x238   :  { %v354_v1 = vrot.slane %v353_v63, 2 }
 0x239   :  { %v349_v2 = vadd.f32 %v348_v0, %v347_v62  ;;  %v3352_v62 = vcombine.high %v1061_v59, %v1065_v60  ;;  %v3351_v0 = vcombine.low %v1061_v59, %v1065_v60 }
 0x23a   :  { %v355_v3 = vadd.f32 %v354_v1, %v353_v63  ;;  %v1066_v63 = vld [vmem:[#allocation10 + $0x68] sm:$0xff] }
 0x23b   :  { %v350_v4 = vrot.slane %v349_v2, 1  ;;  %v3353_v1 = vcombine.low %v1062_v61, %v1066_v63 }
 0x23c   :  { %v356_v5 = vrot.slane %v355_v3, 1 }
 0x23d   :  { %v351_v6 = vadd.f32 %v350_v4, %v349_v2  ;;  %v3354_v2 = vcombine.high %v1062_v61, %v1066_v63  ;;  %v1073_v4 = vld [vmem:[#allocation10 + $0xa0] sm:$0xff] }
 0x23e   :  { %v357_v7 = vadd.f32 %v356_v5, %v355_v3  ;;  %v1069_v3 = vld [vmem:[#allocation10 + $0x80] sm:$0xff] }
 0x23f   :  { %v359_v8 = vmul.f32 0.125, %v351_v6  ;;  %v3360_v40 = vcombine.high %v1069_v3, %v1073_v4  ;;  %v3359_v5 = vcombine.low %v1069_v3, %v1073_v4  ;;  %v1081_v6 = vld [vmem:[#allocation10 + $0xe0] sm:$0xff] }
 0x240   :  { %v360_v9 = vmul.f32 0.125, %v357_v7  ;;  %v1078_v7 = vld [vmem:[#allocation10 + $0xc8] sm:$0xff]  ;;  %v1129_v63 = vld [vmem:[#allocation10 + $0x260] sm:$0xff] }
 0x241   :  { %v361_v10 = vsub.f32 %v340_v55, %v359_v8 }
 0x242   :  { %v362_v11 = vsub.f32 %v342_v57, %v360_v9  ;;  %v1082_v9 = vld [vmem:[#allocation10 + $0xe8] sm:$0xff] }
 0x243   :  { %v363_v12 = vmul.f32 %v361_v10, %v361_v10 }
 0x244   :  { %v364_v13 = vmul.f32 %v362_v11, %v362_v11 }
 0x245   :  { %v365_v14 = vrot.slane %v363_v12, 4 }
 0x246   :  { %v371_v15 = vrot.slane %v364_v13, 4 }
 0x247   :  { %v366_v16 = vadd.f32 %v365_v14, %v363_v12  ;;  %v3370_v12 = vcombine.high %v1078_v7, %v1082_v9  ;;  %v1089_v14 = vld [vmem:[#allocation10 + $0x120] sm:$0xff] }
 0x248   :  { %v372_v17 = vadd.f32 %v371_v15, %v364_v13  ;;  %v1085_v13 = vld [vmem:[#allocation10 + $0x100] sm:$0xff]  ;;  %v1086_v15 = vld [vmem:[#allocation10 + $0x108] sm:$0xff] }
 0x249   :  { %v367_v18 = vrot.slane %v366_v16, 2 }
 0x24a   :  { %v373_v19 = vrot.slane %v372_v17, 2 }
 0x24b   :  { %v368_v20 = vadd.f32 %v367_v18, %v366_v16  ;;  %v3376_v16 = vcombine.high %v1085_v13, %v1089_v14  ;;  %v3375_v18 = vcombine.low %v1085_v13, %v1089_v14 }
 0x24c   :  { %v374_v21 = vadd.f32 %v373_v19, %v372_v17  ;;  %v1090_v17 = vld [vmem:[#allocation10 + $0x128] sm:$0xff] }
 0x24d   :  { %v369_v22 = vrot.slane %v368_v20, 1  ;;  %v3377_v19 = vcombine.low %v1086_v15, %v1090_v17 }
 0x24e   :  { %v375_v23 = vrot.slane %v374_v21, 1 }
 0x24f   :  { %v370_v24 = vadd.f32 %v369_v22, %v368_v20  ;;  %v3378_v20 = vcombine.high %v1086_v15, %v1090_v17  ;;  %v1097_v22 = vld [vmem:[#allocation10 + $0x160] sm:$0xff] }
 0x250   :  { %v376_v25 = vadd.f32 %v375_v23, %v374_v21  ;;  %v1093_v21 = vld [vmem:[#allocation10 + $0x140] sm:$0xff]  ;;  %v1094_v23 = vld [vmem:[#allocation10 + $0x148] sm:$0xff] }
 0x251   :  { %v377_v26 = vmul.f32 0.125, %v370_v24  ;;  %v3384_v24 = vcombine.high %v1093_v21, %v1097_v22  ;;  %v1153_v17 = vld [vmem:[#allocation10 + $0x320] sm:$0xff] }
 0x252   :  { %v378_v27 = vmul.f32 0.125, %v376_v25  ;;  %v1098_v25 = vld [vmem:[#allocation10 + $0x168] sm:$0xff] }
 0x253   :  { %v379_v28 = vadd.f32 0.8, %v377_v26  ;;  %v3383_v26 = vcombine.low %v1093_v21, %v1097_v22 }
 0x254   :  { %v380_v29 = vadd.f32 0.8, %v378_v27  ;;  %v3385_v27 = vcombine.low %v1094_v23, %v1098_v25 }
 0x255   :  { %3800 = vrsqrt.f32 %v379_v28  ;;  %v3386_v28 = vcombine.high %v1094_v23, %v1098_v25  ;;  %v1161_v25 = vld [vmem:[#allocation10 + $0x360] sm:$0xff] }
 0x256   :  { %3802 = vrsqrt.f32 %v380_v29  ;;  %v1101_v29 = vld [vmem:[#allocation10 + $0x180] sm:$0xff] }
 0x25f   :  { %v3801_v33 = vpop.eup %3800 }
 0x260   :  { %v3803_v35 = vpop.eup %3802  ;;  %v383_v36 = vmul.f32 %v3801_v33, %v361_v10  ;;  %v1106_v33 = vld [vmem:[#allocation10 + $0x1a8] sm:$0xff] }
 0x261   :  { %v384_v38 = vmul.f32 %v3803_v35, %v362_v11  ;;  %v3369_v11 = vcombine.low %v1078_v7, %v1082_v9  ;;  %v3393_v35 = vcombine.low %v1102_v31, %v1106_v33  ;;  %v1145_v9 = vld [vmem:[#allocation10 + $0x2e0] sm:$0xff] }
 0x262   :  { %v397_v46 = vmul.f32 %v390_v32, %v383_v36  ;;  %v3392_v32 = vcombine.high %v1101_v29, %v1105_v30  ;;  %v3394_v36 = vcombine.high %v1102_v31, %v1106_v33  ;;  %v1169_v33 = vld [vmem:[#allocation10 + $0x3a0] sm:$0xff] }
 0x263   :  { %v398_v47 = vmul.f32 %v394_v34, %v384_v38  ;;  %v3391_v34 = vcombine.low %v1101_v29, %v1105_v30  ;;  %v1113_v38 = vld [vmem:[#allocation10 + $0x1e0] sm:$0xff] }
 0x264   :  { %v411_v50 = vadd.f32 %v404_v37, %v397_v46  ;;  %v1109_v37 = vld [vmem:[#allocation10 + $0x1c0] sm:$0xff] }
 0x265   :  { %v412_v52 = vadd.f32 %v408_v43, %v398_v47  ;;  %v1110_v43 = vld [vmem:[#allocation10 + $0x1c8] sm:$0xff]  ;;  %v3400_v46 = vcombine.high %v1109_v37, %v1113_v38 }
 0x266   :  { %vm413_vm3 = vcmp.gt.f32.partialorder %v411_v50, 0.0  ;;  %v415_v53 = vmul.f32 0.2, %v411_v50  ;;  %v1114_v47 = vld [vmem:[#allocation10 + $0x1e8] sm:$0xff] }
 0x267   :  { %vm414_vm4 = vcmp.gt.f32.partialorder %v412_v52, 0.0  ;;  %v416_v54 = vmul.f32 0.2, %v412_v52 }
 0x268   :  { %v417_v55 = vsel %vm413_vm3, %v411_v50, %v415_v53  ;;  %v3399_v50 = vcombine.low %v1109_v37, %v1113_v38  ;;  %v3402_v53 = vcombine.high %v1110_v43, %v1114_v47 }
 0x269   :  { %v418_v56 = vsel %vm414_vm4, %v412_v52, %v416_v54  ;;  %v419_v58 = vpack.c.bf16 %v417_v55, %v417_v55  ;;  %v3401_v52 = vcombine.low %v1110_v43, %v1114_v47  ;;  %v1117_v54 = vld [vmem:[#allocation10 + $0x200] sm:$0xff] }
 0x26a   :  { %v420_v57 = vpack.c.bf16 %v418_v56, %v418_v56  ;;  %v1121_v55 = vld [vmem:[#allocation10 + $0x220] sm:$0xff]  ;;  %v1118_v56 = vld [vmem:[#allocation10 + $0x208] sm:$0xff] }
 0x26b   :  { %v3407_v59 = vcombine.low %v1117_v54, %v1121_v55  ;;  %v1177_v47 = vld [vmem:[#allocation10 + $0x3e0] sm:$0xff] }
 0x26c   :  { %859 = vmatprep.mubr.bf16.mxu0 %v420_v57  ;;  %900 = vmatprep.mubr.bf16.mxu1 %v420_v57  ;;  %v3408_v57 = vcombine.high %v1117_v54, %v1121_v55  ;;  %v1178_v54 = vld [vmem:[#allocation10 + $0x3e8] sm:$0xff] }
 0x26d   :  { %860 = vmatmul.mubr.bf16.vlgmr.msra.gmra.mrb[4].mxu0 %v419_v58  ;;  %901 = vmatmul.mubr.bf16.vlgmr.msra.gmra.mrb[4].mxu1 %v419_v58  ;;  %v1122_v58 = vld [vmem:[#allocation10 + $0x228] sm:$0xff] }
 0x26e   :  { %2632 = vmatpush1.bf16.msra.mxu0 %v3343_v42  ;;  %2714 = vmatpush1.bf16.msra.mxu1 %v3345_v45  ;;  %v1074_v42 = vld [vmem:[#allocation10 + $0xa8] sm:$0xff]  ;;  %v1077_v45 = vld [vmem:[#allocation10 + $0xc0] sm:$0xff]  ;;  %v3409_v60 = vcombine.low %v1118_v56, %v1122_v58  ;;  %v3410_v61 = vcombine.high %v1118_v56, %v1122_v58 }
 0x26f   :  { %2633 = vmatprep.subr.bf16.mxu0 %v3352_v62  ;;  %2715 = vmatprep.subr.bf16.mxu1 %v3354_v2  ;;  %v3361_v41 = vcombine.low %v1070_v39, %v1074_v42  ;;  %v3362_v44 = vcombine.high %v1070_v39, %v1074_v42  ;;  %v3368_v8 = vcombine.high %v1077_v45, %v1081_v6  ;;  %v1125_v62 = vld [vmem:[#allocation10 + $0x240] sm:$0xff]  ;;  %v1130_v2 = vld [vmem:[#allocation10 + $0x268] sm:$0xff] }
 0x270   :  { %v3367_v10 = vcombine.low %v1077_v45, %v1081_v6  ;;  %v3415_v3 = vcombine.low %v1125_v62, %v1129_v63  ;;  %v1137_v42 = vld [vmem:[#allocation10 + $0x2a0] sm:$0xff] }
 0x271   :  { %v4167_v58 = vld [vmem:[#allocation10 + $0x420] sm:$0xff] }
 0x272   :  { %2634 = vmatpush1.bf16.msra.mxu0 %v3351_v0  ;;  %2716 = vmatpush1.bf16.msra.mxu1 %v3353_v1  ;;  %v1126_v0 = vld [vmem:[#allocation10 + $0x248] sm:$0xff]  ;;  %v3416_v1 = vcombine.high %v1125_v62, %v1129_v63 }
 0x273   :  { %2635 = vmatprep.subr.bf16.mxu0 %v3360_v40  ;;  %2717 = vmatprep.subr.bf16.mxu1 %v3362_v44  ;;  %v3417_v4 = vcombine.low %v1126_v0, %v1130_v2  ;;  %v3418_v39 = vcombine.high %v1126_v0, %v1130_v2  ;;  %v1133_v40 = vld [vmem:[#allocation10 + $0x280] sm:$0xff]  ;;  %v1138_v44 = vld [vmem:[#allocation10 + $0x2a8] sm:$0xff] }
 0x274   :  { %v3423_v45 = vcombine.low %v1133_v40, %v1137_v42  ;;  %v485_v2 = vld [vmem:[#allocation11 + $0x7] sm:$0xf] }
 0x276   :  { %2636 = vmatpush1.bf16.msra.mxu0 %v3359_v5  ;;  %2718 = vmatpush1.bf16.msra.mxu1 %v3361_v41  ;;  %v1134_v5 = vld [vmem:[#allocation10 + $0x288] sm:$0xff]  ;;  %v3424_v41 = vcombine.high %v1133_v40, %v1137_v42  ;;  %v494_v40 = vrot.slane %v485_v2, %v4151_v51 }
 0x277   :  { %2637 = vmatprep.subr.bf16.mxu0 %v3368_v8  ;;  %2719 = vmatprep.subr.bf16.mxu1 %v3370_v12  ;;  %v3425_v6 = vcombine.low %v1134_v5, %v1138_v44  ;;  %v3426_v7 = vcombine.high %v1134_v5, %v1138_v44  ;;  %v1141_v8 = vld [vmem:[#allocation10 + $0x2c0] sm:$0xff]  ;;  %v1146_v12 = vld [vmem:[#allocation10 + $0x2e8] sm:$0xff] }
 0x278   :  { %v3431_v13 = vcombine.low %v1141_v8, %v1145_v9 }
 0x27a   :  { %2638 = vmatpush1.bf16.msra.mxu0 %v3367_v10  ;;  %2720 = vmatpush1.bf16.msra.mxu1 %v3369_v11  ;;  %v1142_v10 = vld [vmem:[#allocation10 + $0x2c8] sm:$0xff]  ;;  %v3432_v11 = vcombine.high %v1141_v8, %v1145_v9 }
 0x27b   :  { %2639 = vmatprep.subr.bf16.mxu0 %v3376_v16  ;;  %2721 = vmatprep.subr.bf16.mxu1 %v3378_v20  ;;  %v3433_v14 = vcombine.low %v1142_v10, %v1146_v12  ;;  %v3434_v15 = vcombine.high %v1142_v10, %v1146_v12  ;;  %v1149_v16 = vld [vmem:[#allocation10 + $0x300] sm:$0xff]  ;;  %v1154_v20 = vld [vmem:[#allocation10 + $0x328] sm:$0xff] }
 0x27c   :  { %v3439_v21 = vcombine.low %v1149_v16, %v1153_v17 }
 0x27e   :  { %2640 = vmatpush1.bf16.msra.mxu0 %v3375_v18  ;;  %2722 = vmatpush1.bf16.msra.mxu1 %v3377_v19  ;;  %v1150_v18 = vld [vmem:[#allocation10 + $0x308] sm:$0xff]  ;;  %v3440_v19 = vcombine.high %v1149_v16, %v1153_v17 }
 0x27f   :  { %2641 = vmatprep.subr.bf16.mxu0 %v3384_v24  ;;  %2723 = vmatprep.subr.bf16.mxu1 %v3386_v28  ;;  %v3441_v22 = vcombine.low %v1150_v18, %v1154_v20  ;;  %v3442_v23 = vcombine.high %v1150_v18, %v1154_v20  ;;  %v1157_v24 = vld [vmem:[#allocation10 + $0x340] sm:$0xff]  ;;  %v1162_v28 = vld [vmem:[#allocation10 + $0x368] sm:$0xff] }
 0x280   :  { %v3447_v29 = vcombine.low %v1157_v24, %v1161_v25 }
 0x282   :  { %2642 = vmatpush1.bf16.msra.mxu0 %v3383_v26  ;;  %2724 = vmatpush1.bf16.msra.mxu1 %v3385_v27  ;;  %v3448_v26 = vcombine.high %v1157_v24, %v1161_v25  ;;  %v1158_v27 = vld [vmem:[#allocation10 + $0x348] sm:$0xff] }
 0x283   :  { %2643 = vmatprep.subr.bf16.mxu0 %v3392_v32  ;;  %2725 = vmatprep.subr.bf16.mxu1 %v3394_v36  ;;  %v3449_v30 = vcombine.low %v1158_v27, %v1162_v28  ;;  %v3450_v31 = vcombine.high %v1158_v27, %v1162_v28  ;;  %v1165_v32 = vld [vmem:[#allocation10 + $0x380] sm:$0xff]  ;;  %v1170_v36 = vld [vmem:[#allocation10 + $0x3a8] sm:$0xff] }
 0x284   :  { %v3455_v37 = vcombine.low %v1165_v32, %v1169_v33 }
 0x286   :  { %2644 = vmatpush1.bf16.msra.mxu0 %v3391_v34  ;;  %2726 = vmatpush1.bf16.msra.mxu1 %v3393_v35  ;;  %v1166_v34 = vld [vmem:[#allocation10 + $0x388] sm:$0xff]  ;;  %v3456_v35 = vcombine.high %v1165_v32, %v1169_v33 }
 0x287   :  { %2645 = vmatprep.subr.bf16.mxu0 %v3400_v46  ;;  %2727 = vmatprep.subr.bf16.mxu1 %v3402_v53  ;;  %v3457_v38 = vcombine.low %v1166_v34, %v1170_v36  ;;  %v3458_v43 = vcombine.high %v1166_v34, %v1170_v36  ;;  %v1173_v46 = vld [vmem:[#allocation10 + $0x3c0] sm:$0xff] }
 0x288   :  { %v3464_v53 = vcombine.high %v1173_v46, %v1177_v47 }
 0x28a   :  { %2646 = vmatpush1.bf16.msra.mxu0 %v3399_v50  ;;  %2728 = vmatpush1.bf16.msra.mxu1 %v3401_v52  ;;  %v1174_v50 = vld [vmem:[#allocation10 + $0x3c8] sm:$0xff]  ;;  %v3463_v52 = vcombine.low %v1173_v46, %v1177_v47 }
 0x28b   :  { %2647 = vmatprep.subr.bf16.mxu0 %v3408_v57  ;;  %2729 = vmatprep.subr.bf16.mxu1 %v3410_v61  ;;  %v3465_v55 = vcombine.low %v1174_v50, %v1178_v54  ;;  %v3466_v56 = vcombine.high %v1174_v50, %v1178_v54  ;;  %v4165_v57 = vld [vmem:[#allocation10 + $0x400] sm:$0xff]  ;;  %v4173_v61 = vld [vmem:[#allocation10 + $0x428] sm:$0xff] }
 0x28c   :  { %v3471_v62 = vcombine.low %v4165_v57, %v4167_v58 }
 0x28e   :  { %2648 = vmatpush1.bf16.msra.mxu0 %v3407_v59  ;;  %2730 = vmatpush1.bf16.msra.mxu1 %v3409_v60  ;;  %v4169_v59 = vld [vmem:[#allocation10 + $0x408] sm:$0xff]  ;;  %v3472_v60 = vcombine.high %v4165_v57, %v4167_v58 }
 0x28f   :  { %2649 = vmatprep.subr.bf16.mxu0 %v3416_v1  ;;  %2731 = vmatprep.subr.bf16.mxu1 %v3418_v39  ;;  %v3473_v63 = vcombine.low %v4169_v59, %v4173_v61  ;;  %v3474_v0 = vcombine.high %v4169_v59, %v4173_v61  ;;  %v4182_v1 = vsub.s32 2, %v4145_v48 }
 0x291   :  { %v498_v39 = vrot.slane %v485_v2, %v4182_v1 }
 0x292   :  { %2650 = vmatpush1.bf16.msra.mxu0 %v3415_v3  ;;  %2732 = vmatpush1.bf16.msra.mxu1 %v3417_v4  ;;  %v4185_v3 = vsub.s32 3, %v4145_v48  ;;  %v490_v4 = vrot.slane %v485_v2, %v4148_v49 }
 0x293   :  { %2651 = vmatprep.subr.bf16.mxu0 %v3424_v41  ;;  %2733 = vmatprep.subr.bf16.mxu1 %v3426_v7 }
 0x294   :  { %v502_v42 = vrot.slane %v485_v2, %v4185_v3 }
 0x296   :  { %2652 = vmatpush1.bf16.msra.mxu0 %v3423_v45  ;;  %2734 = vmatpush1.bf16.msra.mxu1 %v3425_v6 }
 0x297   :  { %2653 = vmatprep.subr.bf16.mxu0 %v3432_v11  ;;  %2735 = vmatprep.subr.bf16.mxu1 %v3434_v15 }
 0x29a   :  { %2654 = vmatpush1.bf16.msra.mxu0 %v3431_v13  ;;  %2736 = vmatpush1.bf16.msra.mxu1 %v3433_v14 }
 0x29b   :  { %2655 = vmatprep.subr.bf16.mxu0 %v3440_v19  ;;  %2737 = vmatprep.subr.bf16.mxu1 %v3442_v23 }
 0x29e   :  { %2656 = vmatpush1.bf16.msra.mxu0 %v3439_v21  ;;  %2738 = vmatpush1.bf16.msra.mxu1 %v3441_v22 }
 0x29f   :  { %2657 = vmatprep.subr.bf16.mxu0 %v3448_v26  ;;  %2739 = vmatprep.subr.bf16.mxu1 %v3450_v31 }
 0x2a2   :  { %2658 = vmatpush1.bf16.msra.mxu0 %v3447_v29  ;;  %2740 = vmatpush1.bf16.msra.mxu1 %v3449_v30 }
 0x2a3   :  { %2659 = vmatprep.subr.bf16.mxu0 %v3456_v35  ;;  %2741 = vmatprep.subr.bf16.mxu1 %v3458_v43 }
 0x2a6   :  { %2660 = vmatpush1.bf16.msra.mxu0 %v3455_v37  ;;  %2742 = vmatpush1.bf16.msra.mxu1 %v3457_v38 }
 0x2a7   :  { %2661 = vmatprep.subr.bf16.mxu0 %v3464_v53  ;;  %2743 = vmatprep.subr.bf16.mxu1 %v3466_v56 }
 0x2aa   :  { %2662 = vmatpush1.bf16.msra.mxu0 %v3463_v52  ;;  %2744 = vmatpush1.bf16.msra.mxu1 %v3465_v55 }
 0x2ab   :  { %2672 = vmatprep.subr.bf16.mxu0 %v3472_v60  ;;  %2754 = vmatprep.subr.bf16.mxu1 %v3474_v0 }
 0x340   :  { %v861_v5 = vpop.f32.mrb[4].mxu0  ;;  %v902_v41 = vpop.f32.mrb[4].mxu1 }
 0x341   :  { %v862_v44 = vadd.f32 %v861_v5, %v490_v4  ;;  %v903_v45 = vadd.f32 %v902_v41, %v498_v39  ;;  %v863_v6 = vpop.f32.mrb[5].mxu0  ;;  %v904_v7 = vpop.f32.mrb[5].mxu1 }
 0x342   :  { %v864_v8 = vadd.f32 %v863_v6, %v494_v40  ;;  %v905_v9 = vadd.f32 %v904_v7, %v502_v42  ;;  %v865_v10 = vpop.f32.mrb[6].mxu0  ;;  %v906_v11 = vpop.f32.mrb[6].mxu1 }
 0x343   :  { %v909_v12 = vrot.slane %v862_v44, 4  ;;  %v921_v13 = vrot.slane %v903_v45, 4  ;;  %v866_v14 = vpop.f32.mrb[7].mxu0  ;;  %v907_v15 = vpop.f32.mrb[7].mxu1 }
 0x344   :  { %v915_v16 = vrot.slane %v864_v8, 4  ;;  %v927_v17 = vrot.slane %v905_v9, 4 }
 0x345   :  { %v910_v18 = vadd.f32 %v909_v12, %v862_v44  ;;  %v922_v19 = vadd.f32 %v921_v13, %v903_v45 }
 0x346   :  { %v916_v20 = vadd.f32 %v915_v16, %v864_v8  ;;  %v928_v21 = vadd.f32 %v927_v17, %v905_v9 }
 0x347   :  { %v911_v22 = vrot.slane %v910_v18, 2  ;;  %v923_v23 = vrot.slane %v922_v19, 2 }
 0x348   :  { %v917_v24 = vrot.slane %v916_v20, 2  ;;  %v929_v25 = vrot.slane %v928_v21, 2 }
 0x349   :  { %v912_v26 = vadd.f32 %v911_v22, %v910_v18  ;;  %v924_v27 = vadd.f32 %v923_v23, %v922_v19 }
 0x34a   :  { %v918_v28 = vadd.f32 %v917_v24, %v916_v20  ;;  %v930_v29 = vadd.f32 %v929_v25, %v928_v21 }
 0x34b   :  { %v913_v30 = vrot.slane %v912_v26, 1  ;;  %v925_v31 = vrot.slane %v924_v27, 1 }
 0x34c   :  { %v919_v32 = vrot.slane %v918_v28, 1  ;;  %v931_v33 = vrot.slane %v930_v29, 1 }
 0x34d   :  { %v914_v34 = vadd.f32 %v913_v30, %v912_v26  ;;  %v926_v35 = vadd.f32 %v925_v31, %v924_v27  ;;  %v1011_v30 = vld [vmem:[#allocation11 + $0xf] sm:$0xf] }
 0x34e   :  { %v920_v36 = vadd.f32 %v919_v32, %v918_v28  ;;  %v932_v37 = vadd.f32 %v931_v33, %v930_v29  ;;  %v985_v29 = vld [vmem:[#allocation11 + $0xb] sm:$0xf] }
 0x34f   :  { %v933_v38 = vmul.f32 0.125, %v914_v34  ;;  %v935_v43 = vmul.f32 0.125, %v926_v35  ;;  %v990_v31 = vrot.slane %v985_v29, %v4148_v49  ;;  %v998_v33 = vrot.slane %v985_v29, %v4182_v1 }
 0x350   :  { %v934_v46 = vmul.f32 0.125, %v920_v36  ;;  %v936_v47 = vmul.f32 0.125, %v932_v37  ;;  %v1016_v36 = vrot.slane %v1011_v30, %v4148_v49  ;;  %v994_v37 = vrot.slane %v985_v29, %v4151_v51 }
 0x351   :  { %v937_v50 = vsub.f32 %v862_v44, %v933_v38  ;;  %v939_v52 = vsub.f32 %v903_v45, %v935_v43 }
 0x352   :  { %v938_v53 = vsub.f32 %v864_v8, %v934_v46  ;;  %v940_v54 = vsub.f32 %v905_v9, %v936_v47  ;;  %v1024_v46 = vrot.slane %v1011_v30, %v4182_v1  ;;  %v1002_v47 = vrot.slane %v985_v29, %v4185_v3  ;;  %v1214_v29 = vld [vmem:[#allocation10 + $0x508] sm:$0xff] }
 0x353   :  { %v941_v55 = vmul.f32 %v937_v50, %v937_v50  ;;  %v943_v56 = vmul.f32 %v939_v52, %v939_v52 }
 0x354   :  { %v942_v60 = vmul.f32 %v938_v53, %v938_v53  ;;  %v944_v0 = vmul.f32 %v940_v54, %v940_v54 }
 0x355   :  { %v945_v2 = vrot.slane %v941_v55, 4  ;;  %v957_v4 = vrot.slane %v943_v56, 4 }
 0x356   :  { %v951_v39 = vrot.slane %v942_v60, 4  ;;  %v963_v40 = vrot.slane %v944_v0, 4 }
 0x357   :  { %v946_v42 = vadd.f32 %v945_v2, %v941_v55  ;;  %v958_v5 = vadd.f32 %v957_v4, %v943_v56 }
 0x358   :  { %v952_v41 = vadd.f32 %v951_v39, %v942_v60  ;;  %v964_v6 = vadd.f32 %v963_v40, %v944_v0  ;;  %v1020_v0 = vrot.slane %v1011_v30, %v4151_v51  ;;  %v1028_v39 = vrot.slane %v1011_v30, %v4185_v3  ;;  %v1218_v30 = vld [vmem:[#allocation10 + $0x528] sm:$0xff] }
 0x359   :  { %v947_v7 = vrot.slane %v946_v42, 2  ;;  %v959_v10 = vrot.slane %v958_v5, 2 }
 0x35a   :  { %v953_v11 = vrot.slane %v952_v41, 2  ;;  %v965_v12 = vrot.slane %v964_v6, 2 }
 0x35b   :  { %v948_v44 = vadd.f32 %v947_v7, %v946_v42  ;;  %v960_v45 = vadd.f32 %v959_v10, %v958_v5 }
 0x35c   :  { %v954_v8 = vadd.f32 %v953_v11, %v952_v41  ;;  %v966_v9 = vadd.f32 %v965_v12, %v964_v6  ;;  %v1189_v11 = vld [vmem:[#allocation10 + $0x440] sm:$0xff] }
 0x35d   :  { %v949_v13 = vrot.slane %v948_v44, 1  ;;  %v961_v14 = vrot.slane %v960_v45, 1 }
 0x35e   :  { %v955_v15 = vrot.slane %v954_v8, 1  ;;  %v967_v16 = vrot.slane %v966_v9, 1 }
 0x35f   :  { %v950_v17 = vadd.f32 %v949_v13, %v948_v44  ;;  %v962_v18 = vadd.f32 %v961_v14, %v960_v45  ;;  %v1193_v44 = vld [vmem:[#allocation10 + $0x460] sm:$0xff]  ;;  %v1194_v45 = vld [vmem:[#allocation10 + $0x468] sm:$0xff] }
 0x360   :  { %v956_v19 = vadd.f32 %v955_v15, %v954_v8  ;;  %v968_v20 = vadd.f32 %v967_v16, %v966_v9  ;;  %v1197_v14 = vld [vmem:[#allocation10 + $0x480] sm:$0xff]  ;;  %v3480_v15 = vcombine.high %v1189_v11, %v1193_v44 }
 0x361   :  { %v969_v21 = vmul.f32 0.125, %v950_v17  ;;  %v971_v22 = vmul.f32 0.125, %v962_v18  ;;  %v1201_v17 = vld [vmem:[#allocation10 + $0x4a0] sm:$0xff]  ;;  %v1198_v18 = vld [vmem:[#allocation10 + $0x488] sm:$0xff] }
 0x362   :  { %v970_v23 = vmul.f32 0.125, %v956_v19  ;;  %v972_v24 = vmul.f32 0.125, %v968_v20  ;;  %v1202_v19 = vld [vmem:[#allocation10 + $0x4a8] sm:$0xff]  ;;  %v3487_v57 = vcombine.low %v1197_v14, %v1201_v17 }
 0x363   :  { %v973_v25 = vadd.f32 0.8, %v969_v21  ;;  %v975_v26 = vadd.f32 0.8, %v971_v22  ;;  %v3479_v21 = vcombine.low %v1189_v11, %v1193_v44  ;;  %v3489_v58 = vcombine.low %v1198_v18, %v1202_v19  ;;  %v1249_v44 = vld [vmem:[#allocation10 + $0x620] sm:$0xff] }
 0x364   :  { %v974_v27 = vadd.f32 0.8, %v970_v23  ;;  %v976_v28 = vadd.f32 0.8, %v972_v24  ;;  %v3488_v23 = vcombine.high %v1197_v14, %v1201_v17  ;;  %v3490_v24 = vcombine.high %v1198_v18, %v1202_v19  ;;  %v1253_v17 = vld [vmem:[#allocation10 + $0x640] sm:$0xff]  ;;  %v1254_v19 = vld [vmem:[#allocation10 + $0x648] sm:$0xff] }
 0x365   :  { %3804 = vrsqrt.f32 %v973_v25  ;;  %v1205_v25 = vld [vmem:[#allocation10 + $0x4c0] sm:$0xff] }
 0x366   :  { %3806 = vrsqrt.f32 %v975_v26  ;;  %v1209_v26 = vld [vmem:[#allocation10 + $0x4e0] sm:$0xff] }
 0x367   :  { %3808 = vrsqrt.f32 %v974_v27  ;;  %v1206_v27 = vld [vmem:[#allocation10 + $0x4c8] sm:$0xff]  ;;  %v3496_v59 = vcombine.high %v1205_v25, %v1209_v26  ;;  %v1257_v18 = vld [vmem:[#allocation10 + $0x660] sm:$0xff] }
 0x368   :  { %3810 = vrsqrt.f32 %v976_v28  ;;  %v1210_v28 = vld [vmem:[#allocation10 + $0x4e8] sm:$0xff] }
 0x369   :  { %v3498_v61 = vcombine.high %v1206_v27, %v1210_v28 }
 0x36f   :  { %v3805_v32 = vpop.eup %3804 }
 0x370   :  { %v3807_v34 = vpop.eup %3806  ;;  %v981_v35 = vmul.f32 %v3805_v32, %v937_v50  ;;  %v3497_v32 = vcombine.low %v1206_v27, %v1210_v28  ;;  %v1265_v27 = vld [vmem:[#allocation10 + $0x6a0] sm:$0xff]  ;;  %v1262_v28 = vld [vmem:[#allocation10 + $0x688] sm:$0xff] }
 0x371   :  { %v3809_v38 = vpop.eup %3808  ;;  %v983_v43 = vmul.f32 %v3807_v34, %v939_v52  ;;  %v3506_v34 = vcombine.high %v1214_v29, %v1218_v30 }
 0x372   :  { %v3811_v55 = vpop.eup %3810  ;;  %v1007_v56 = vmul.f32 %v990_v31, %v981_v35  ;;  %v982_v60 = vmul.f32 %v3809_v38, %v938_v53  ;;  %v3495_v31 = vcombine.low %v1205_v25, %v1209_v26  ;;  %v1221_v35 = vld [vmem:[#allocation10 + $0x540] sm:$0xff]  ;;  %v1226_v38 = vld [vmem:[#allocation10 + $0x568] sm:$0xff] }
 0x373   :  { %v1009_v2 = vmul.f32 %v998_v33, %v983_v43  ;;  %v984_v4 = vmul.f32 %v3811_v55, %v940_v54  ;;  %v1190_v54 = vld [vmem:[#allocation10 + $0x448] sm:$0xff]  ;;  %v1261_v26 = vld [vmem:[#allocation10 + $0x680] sm:$0xff] }
 0x374   :  { %v1033_v50 = vadd.f32 %v1016_v36, %v1007_v56  ;;  %v1008_v40 = vmul.f32 %v994_v37, %v982_v60  ;;  %v3482_v16 = vcombine.high %v1190_v54, %v1194_v45  ;;  %v3481_v22 = vcombine.low %v1190_v54, %v1194_v45  ;;  %v1225_v36 = vld [vmem:[#allocation10 + $0x560] sm:$0xff]  ;;  %v1222_v37 = vld [vmem:[#allocation10 + $0x548] sm:$0xff] }
 0x375   :  { %v4199_v42 = vadd.f32 %v1024_v46, %v1009_v2  ;;  %v1010_v5 = vmul.f32 %v1002_v47, %v984_v4  ;;  %v3505_v46 = vcombine.low %v1214_v29, %v1218_v30  ;;  %v3512_v47 = vcombine.high %v1221_v35, %v1225_v36  ;;  %v1229_v56 = vld [vmem:[#allocation10 + $0x580] sm:$0xff]  ;;  %v1234_v2 = vld [vmem:[#allocation10 + $0x5a8] sm:$0xff] }
 0x376   :  { %v1034_v41 = vadd.f32 %v1020_v0, %v1008_v40  ;;  %vm1037_vm5 = vcmp.gt.f32.partialorder %v1033_v50, 0.0  ;;  %v1041_v52 = vmul.f32 0.2, %v1033_v50  ;;  %v3514_v55 = vcombine.high %v1222_v37, %v1226_v38  ;;  %v1233_v60 = vld [vmem:[#allocation10 + $0x5a0] sm:$0xff]  ;;  %v1230_v0 = vld [vmem:[#allocation10 + $0x588] sm:$0xff] }
 0x377   :  { %v1036_v6 = vadd.f32 %v1028_v39, %v1010_v5  ;;  %v3511_v4 = vcombine.low %v1221_v35, %v1225_v36  ;;  %v3513_v39 = vcombine.low %v1222_v37, %v1226_v38  ;;  %v3522_v40 = vcombine.high %v1230_v0, %v1234_v2  ;;  %v1237_v5 = vld [vmem:[#allocation10 + $0x5c0] sm:$0xff]  ;;  %v1246_v54 = vld [vmem:[#allocation10 + $0x608] sm:$0xff] }
 0x378   :  { %vm1038_vm6 = vcmp.gt.f32.partialorder %v1034_v41, 0.0  ;;  %v1042_v7 = vmul.f32 0.2, %v1034_v41  ;;  %v1045_v10 = vsel %vm1037_vm5, %v1033_v50, %v1041_v52  ;;  %v3520_v50 = vcombine.high %v1229_v56, %v1233_v60  ;;  %v1238_v52 = vld [vmem:[#allocation10 + $0x5c8] sm:$0xff]  ;;  %v1273_v29 = vld [vmem:[#allocation10 + $0x6e0] sm:$0xff] }
 0x379   :  { %vm1040_vm7 = vcmp.gt.f32.partialorder %v1036_v6, 0.0  ;;  %v1044_v53 = vmul.f32 0.2, %v1036_v6  ;;  %v4203_v13 = vpack.c.bf16 %v1045_v10, %v1045_v10  ;;  %v3521_v10 = vcombine.low %v1230_v0, %v1234_v2  ;;  %v1250_v45 = vld [vmem:[#allocation10 + $0x628] sm:$0xff]  ;;  %v1277_v36 = vld [vmem:[#allocation10 + $0x700] sm:$0xff] }
 0x37a   :  { %v1046_v12 = vsel %vm1038_vm6, %v1034_v41, %v1042_v7  ;;  %v1241_v41 = vld [vmem:[#allocation10 + $0x5e0] sm:$0xff]  ;;  %v3519_v7 = vcombine.low %v1229_v56, %v1233_v60  ;;  %v1270_v30 = vld [vmem:[#allocation10 + $0x6c8] sm:$0xff]  ;;  %vm1039_vm8 = vcmp.gt.f32.partialorder %v4199_v42, 0.0 }
 0x37b   :  { %v4201_v8 = vpack.c.bf16 %v1046_v12, %v1046_v12  ;;  %v1048_v9 = vsel %vm1040_vm7, %v1036_v6, %v1044_v53  ;;  %v1242_v6 = vld [vmem:[#allocation10 + $0x5e8] sm:$0xff]  ;;  %v3528_v53 = vcombine.high %v1237_v5, %v1241_v41  ;;  %v1245_v12 = vld [vmem:[#allocation10 + $0x600] sm:$0xff] }
 0x37c   :  { %v4209_v20 = vpack.c.bf16 %v1048_v9, %v1048_v9  ;;  %v3530_v11 = vcombine.high %v1238_v52, %v1242_v6  ;;  %v3527_v9 = vcombine.low %v1237_v5, %v1241_v41  ;;  %v3529_v14 = vcombine.low %v1238_v52, %v1242_v6  ;;  %v1281_v37 = vld [vmem:[#allocation10 + $0x720] sm:$0xff]  ;;  %v1278_v38 = vld [vmem:[#allocation10 + $0x708] sm:$0xff] }
 0x37d   :  { %2663 = vmatprep.mubr.bf16.mxu0 %v4201_v8  ;;  %2745 = vmatprep.mubr.bf16.mxu1 %v4201_v8  ;;  %v1285_v60 = vld [vmem:[#allocation10 + $0x740] sm:$0xff]  ;;  %v1286_v2 = vld [vmem:[#allocation10 + $0x748] sm:$0xff] }
 0x37e   :  { %2664 = vmatmul.mubr.bf16.vlgmr.msra.gmra.mrb[8].mxu0 %v4203_v13  ;;  %2746 = vmatmul.mubr.bf16.vlgmr.msra.gmra.mrb[8].mxu1 %v4203_v13  ;;  %v1289_v0 = vld [vmem:[#allocation10 + $0x760] sm:$0xff]  ;;  %v1294_v6 = vld [vmem:[#allocation10 + $0x788] sm:$0xff] }
 0x37f   :  { %2673 = vmatpush1.bf16.msra.mxu0 %v3471_v62  ;;  %2755 = vmatpush1.bf16.msra.mxu1 %v3473_v63  ;;  %v1213_v62 = vld [vmem:[#allocation10 + $0x500] sm:$0xff] }
 0x380   :  { %2704 = vmatprep.mubr.bf16.mxu0 %v4209_v20  ;;  %2786 = vmatprep.mubr.bf16.mxu1 %v4209_v20  ;;  %v1217_v63 = vld [vmem:[#allocation10 + $0x520] sm:$0xff] }
 0x381   :  { %2674 = vmatprep.subr.bf16.mxu0 %v3480_v15  ;;  %2756 = vmatprep.subr.bf16.mxu1 %v3482_v16  ;;  %v3504_v33 = vcombine.high %v1213_v62, %v1217_v63  ;;  %v3503_v43 = vcombine.low %v1213_v62, %v1217_v63  ;;  %v3536_v15 = vcombine.high %v1245_v12, %v1249_v44  ;;  %v1269_v63 = vld [vmem:[#allocation10 + $0x6c0] sm:$0xff] }
 0x382   :  { %v3538_v16 = vcombine.high %v1246_v54, %v1250_v45  ;;  %v1293_v41 = vld [vmem:[#allocation10 + $0x780] sm:$0xff] }
 0x383   :  { %2675 = vmatpush1.bf16.msra.mxu0 %v3479_v21  ;;  %2757 = vmatpush1.bf16.msra.mxu1 %v3481_v22  ;;  %v1258_v21 = vld [vmem:[#allocation10 + $0x668] sm:$0xff]  ;;  %v3535_v22 = vcombine.low %v1245_v12, %v1249_v44  ;;  %v1297_v52 = vld [vmem:[#allocation10 + $0x7a0] sm:$0xff] }
 0x384   :  { %2676 = vmatprep.subr.bf16.mxu0 %v3488_v23  ;;  %2758 = vmatprep.subr.bf16.mxu1 %v3490_v24  ;;  %v3537_v23 = vcombine.low %v1246_v54, %v1250_v45  ;;  %v3544_v24 = vcombine.high %v1253_v17, %v1257_v18  ;;  %v3546_v25 = vcombine.high %v1254_v19, %v1258_v21  ;;  %v1301_v44 = vld [vmem:[#allocation10 + $0x7c0] sm:$0xff]  ;;  %v1302_v45 = vld [vmem:[#allocation10 + $0x7c8] sm:$0xff] }
 0x385   :  { %v1305_v54 = vld [vmem:[#allocation10 + $0x7e0] sm:$0xff] }
 0x387   :  { %2677 = vmatpush1.bf16.msra.mxu0 %v3487_v57  ;;  %2759 = vmatpush1.bf16.msra.mxu1 %v3489_v58  ;;  %v1266_v57 = vld [vmem:[#allocation10 + $0x6a8] sm:$0xff]  ;;  %v3543_v58 = vcombine.low %v1253_v17, %v1257_v18  ;;  %v1055_v18 = vld [vmem:[#allocation10 + $0x10] sm:$0xff] }
 0x388   :  { %2678 = vmatprep.subr.bf16.mxu0 %v3496_v59  ;;  %2760 = vmatprep.subr.bf16.mxu1 %v3498_v61  ;;  %v3545_v59 = vcombine.low %v1254_v19, %v1258_v21  ;;  %v3552_v61 = vcombine.high %v1261_v26, %v1265_v27  ;;  %v3554_v62 = vcombine.high %v1262_v28, %v1266_v57  ;;  %v1043_v19 = vmul.f32 0.2, %v4199_v42  ;;  %v1059_v21 = vld [vmem:[#allocation10 + $0x30] sm:$0xff] }
 0x38b   :  { %2679 = vmatpush1.bf16.msra.mxu0 %v3495_v31  ;;  %2761 = vmatpush1.bf16.msra.mxu1 %v3497_v32  ;;  %v1274_v31 = vld [vmem:[#allocation10 + $0x6e8] sm:$0xff]  ;;  %v3551_v32 = vcombine.low %v1261_v26, %v1265_v27  ;;  %v3348_v26 = vcombine.high %v1055_v18, %v1059_v21 }
 0x38c   :  { %2680 = vmatprep.subr.bf16.mxu0 %v3504_v33  ;;  %2762 = vmatprep.subr.bf16.mxu1 %v3506_v34  ;;  %v3553_v33 = vcombine.low %v1262_v28, %v1266_v57  ;;  %v3560_v34 = vcombine.high %v1269_v63, %v1273_v29  ;;  %v3562_v35 = vcombine.high %v1270_v30, %v1274_v31  ;;  %v1063_v57 = vld [vmem:[#allocation10 + $0x50] sm:$0xff] }
 0x38d   :  { %v1047_v28 = vsel %vm1039_vm8, %v4199_v42, %v1043_v19  ;;  %v1072_v42 = vld [vmem:[#allocation10 + $0x98] sm:$0xff] }
 0x38f   :  { %2681 = vmatpush1.bf16.msra.mxu0 %v3503_v43  ;;  %2763 = vmatpush1.bf16.msra.mxu1 %v3505_v46  ;;  %v1282_v43 = vld [vmem:[#allocation10 + $0x728] sm:$0xff]  ;;  %v3559_v46 = vcombine.low %v1269_v63, %v1273_v29  ;;  %v4222_v63 = vpack.c.bf16 %v1047_v28, %v1047_v28 }
 0x390   :  { %2682 = vmatprep.subr.bf16.mxu0 %v3512_v47  ;;  %2764 = vmatprep.subr.bf16.mxu1 %v3514_v55  ;;  %v3561_v47 = vcombine.low %v1270_v30, %v1274_v31  ;;  %v3568_v55 = vcombine.high %v1277_v36, %v1281_v37  ;;  %v3570_v56 = vcombine.high %v1278_v38, %v1282_v43 }
 0x393   :  { %2683 = vmatpush1.bf16.msra.mxu0 %v3511_v4  ;;  %2765 = vmatpush1.bf16.msra.mxu1 %v3513_v39  ;;  %v1290_v4 = vld [vmem:[#allocation10 + $0x768] sm:$0xff]  ;;  %v3567_v39 = vcombine.low %v1277_v36, %v1281_v37 }
 0x394   :  { %2684 = vmatprep.subr.bf16.mxu0 %v3520_v50  ;;  %2766 = vmatprep.subr.bf16.mxu1 %v3522_v40  ;;  %v3569_v50 = vcombine.low %v1278_v38, %v1282_v43  ;;  %v3576_v40 = vcombine.high %v1285_v60, %v1289_v0  ;;  %v3578_v5 = vcombine.high %v1286_v2, %v1290_v4  ;;  %v1079_v43 = vld [vmem:[#allocation10 + $0xd0] sm:$0xff] }
 0x397   :  { %2685 = vmatpush1.bf16.msra.mxu0 %v3519_v7  ;;  %2767 = vmatpush1.bf16.msra.mxu1 %v3521_v10  ;;  %v1298_v7 = vld [vmem:[#allocation10 + $0x7a8] sm:$0xff]  ;;  %v3575_v10 = vcombine.low %v1285_v60, %v1289_v0 }
 0x398   :  { %2686 = vmatprep.subr.bf16.mxu0 %v3528_v53  ;;  %2768 = vmatprep.subr.bf16.mxu1 %v3530_v11  ;;  %v3577_v53 = vcombine.low %v1286_v2, %v1290_v4  ;;  %v3584_v11 = vcombine.high %v1293_v41, %v1297_v52  ;;  %v3586_v12 = vcombine.high %v1294_v6, %v1298_v7  ;;  %v1087_v4 = vld [vmem:[#allocation10 + $0x110] sm:$0xff] }
 0x39b   :  { %2687 = vmatpush1.bf16.msra.mxu0 %v3527_v9  ;;  %2769 = vmatpush1.bf16.msra.mxu1 %v3529_v14  ;;  %v1306_v9 = vld [vmem:[#allocation10 + $0x7e8] sm:$0xff]  ;;  %v3583_v14 = vcombine.low %v1293_v41, %v1297_v52 }
 0x39c   :  { %2688 = vmatprep.subr.bf16.mxu0 %v3536_v15  ;;  %2770 = vmatprep.subr.bf16.mxu1 %v3538_v16  ;;  %v3585_v15 = vcombine.low %v1294_v6, %v1298_v7  ;;  %v3592_v16 = vcombine.high %v1301_v44, %v1305_v54  ;;  %v3594_v17 = vcombine.high %v1302_v45, %v1306_v9  ;;  %v1095_v6 = vld [vmem:[#allocation10 + $0x150] sm:$0xff] }
 0x39d   :  { %v1099_v7 = vld [vmem:[#allocation10 + $0x170] sm:$0xff] }
 0x39f   :  { %2689 = vmatpush1.bf16.msra.mxu0 %v3535_v22  ;;  %2771 = vmatpush1.bf16.msra.mxu1 %v3537_v23  ;;  %v1056_v22 = vld [vmem:[#allocation10 + $0x18] sm:$0xff] }
 0x3a0   :  { %2690 = vmatprep.subr.bf16.mxu0 %v3544_v24  ;;  %2772 = vmatprep.subr.bf16.mxu1 %v3546_v25  ;;  %v1060_v23 = vld [vmem:[#allocation10 + $0x38] sm:$0xff]  ;;  %v3591_v24 = vcombine.low %v1301_v44, %v1305_v54  ;;  %v3593_v25 = vcombine.low %v1302_v45, %v1306_v9  ;;  %v3388_v44 = vcombine.high %v1095_v6, %v1099_v7  ;;  %v1103_v45 = vld [vmem:[#allocation10 + $0x190] sm:$0xff] }
 0x3a1   :  { %v3350_v27 = vcombine.high %v1056_v22, %v1060_v23  ;;  %v3349_v29 = vcombine.low %v1056_v22, %v1060_v23  ;;  %v1107_v9 = vld [vmem:[#allocation10 + $0x1b0] sm:$0xff]  ;;  %v1112_v23 = vld [vmem:[#allocation10 + $0x1d8] sm:$0xff] }
 0x3a2   :  { %v1115_v22 = vld [vmem:[#allocation10 + $0x1f0] sm:$0xff] }
 0x3a3   :  { %2691 = vmatpush1.bf16.msra.mxu0 %v3543_v58  ;;  %2773 = vmatpush1.bf16.msra.mxu1 %v3545_v59  ;;  %v1067_v58 = vld [vmem:[#allocation10 + $0x70] sm:$0xff]  ;;  %v1064_v59 = vld [vmem:[#allocation10 + $0x58] sm:$0xff] }
 0x3a4   :  { %2692 = vmatprep.subr.bf16.mxu0 %v3552_v61  ;;  %2774 = vmatprep.subr.bf16.mxu1 %v3554_v62  ;;  %v1068_v61 = vld [vmem:[#allocation10 + $0x78] sm:$0xff]  ;;  %v3347_v62 = vcombine.low %v1055_v18, %v1059_v21  ;;  %v3356_v30 = vcombine.high %v1063_v57, %v1067_v58  ;;  %v3396_v18 = vcombine.high %v1103_v45, %v1107_v9  ;;  %v1111_v21 = vld [vmem:[#allocation10 + $0x1d0] sm:$0xff] }
 0x3a5   :  { %v3358_v31 = vcombine.high %v1064_v59, %v1068_v61  ;;  %v3357_v36 = vcombine.low %v1064_v59, %v1068_v61  ;;  %v1120_v59 = vld [vmem:[#allocation10 + $0x218] sm:$0xff] }
 0x3a6   :  { %v1124_v61 = vld [vmem:[#allocation10 + $0x238] sm:$0xff] }
 0x3a7   :  { %2693 = vmatpush1.bf16.msra.mxu0 %v3551_v32  ;;  %2775 = vmatpush1.bf16.msra.mxu1 %v3553_v33  ;;  %v1071_v32 = vld [vmem:[#allocation10 + $0x90] sm:$0xff] }
 0x3a8   :  { %2694 = vmatprep.subr.bf16.mxu0 %v3560_v34  ;;  %2776 = vmatprep.subr.bf16.mxu1 %v3562_v35  ;;  %v1075_v33 = vld [vmem:[#allocation10 + $0xb0] sm:$0xff]  ;;  %v1076_v34 = vld [vmem:[#allocation10 + $0xb8] sm:$0xff]  ;;  %v3355_v35 = vcombine.low %v1063_v57, %v1067_v58 }
 0x3a9   :  { %v3364_v37 = vcombine.high %v1071_v32, %v1075_v33  ;;  %v3366_v38 = vcombine.high %v1072_v42, %v1076_v34  ;;  %v3365_v60 = vcombine.low %v1072_v42, %v1076_v34  ;;  %v1119_v57 = vld [vmem:[#allocation10 + $0x210] sm:$0xff]  ;;  %v1128_v42 = vld [vmem:[#allocation10 + $0x258] sm:$0xff] }
 0x3aa   :  { %v1123_v58 = vld [vmem:[#allocation10 + $0x230] sm:$0xff]  ;;  %v1132_v34 = vld [vmem:[#allocation10 + $0x278] sm:$0xff] }
 0x3ab   :  { %2695 = vmatpush1.bf16.msra.mxu0 %v3559_v46  ;;  %2777 = vmatpush1.bf16.msra.mxu1 %v3561_v47  ;;  %v1083_v46 = vld [vmem:[#allocation10 + $0xf0] sm:$0xff]  ;;  %v1080_v47 = vld [vmem:[#allocation10 + $0xd8] sm:$0xff] }
 0x3ac   :  { %2696 = vmatprep.subr.bf16.mxu0 %v3568_v55  ;;  %2778 = vmatprep.subr.bf16.mxu1 %v3570_v56  ;;  %v1084_v55 = vld [vmem:[#allocation10 + $0xf8] sm:$0xff]  ;;  %v3363_v56 = vcombine.low %v1071_v32, %v1075_v33  ;;  %v3372_v0 = vcombine.high %v1079_v43, %v1083_v46  ;;  %v1127_v32 = vld [vmem:[#allocation10 + $0x250] sm:$0xff] }
 0x3ad   :  { %v3374_v2 = vcombine.high %v1080_v47, %v1084_v55  ;;  %v1131_v33 = vld [vmem:[#allocation10 + $0x270] sm:$0xff] }
 0x3af   :  { %2697 = vmatpush1.bf16.msra.mxu0 %v3567_v39  ;;  %2779 = vmatpush1.bf16.msra.mxu1 %v3569_v50  ;;  %v1091_v39 = vld [vmem:[#allocation10 + $0x130] sm:$0xff]  ;;  %v1092_v50 = vld [vmem:[#allocation10 + $0x138] sm:$0xff] }
 0x3b0   :  { %2698 = vmatprep.subr.bf16.mxu0 %v3576_v40  ;;  %2780 = vmatprep.subr.bf16.mxu1 %v3578_v5  ;;  %v3371_v40 = vcombine.low %v1079_v43, %v1083_v46  ;;  %v3373_v5 = vcombine.low %v1080_v47, %v1084_v55  ;;  %v3380_v41 = vcombine.high %v1087_v4, %v1091_v39  ;;  %v1135_v43 = vld [vmem:[#allocation10 + $0x290] sm:$0xff]  ;;  %v1136_v47 = vld [vmem:[#allocation10 + $0x298] sm:$0xff] }
 0x3b1   :  { %v1139_v46 = vld [vmem:[#allocation10 + $0x2b0] sm:$0xff]  ;;  %v1140_v55 = vld [vmem:[#allocation10 + $0x2b8] sm:$0xff] }
 0x3b3   :  { %2699 = vmatpush1.bf16.msra.mxu0 %v3575_v10  ;;  %2781 = vmatpush1.bf16.msra.mxu1 %v3577_v53  ;;  %v1096_v10 = vld [vmem:[#allocation10 + $0x158] sm:$0xff] }
 0x3b4   :  { %2700 = vmatprep.subr.bf16.mxu0 %v3584_v11  ;;  %2782 = vmatprep.subr.bf16.mxu1 %v3586_v12  ;;  %v1100_v53 = vld [vmem:[#allocation10 + $0x178] sm:$0xff]  ;;  %v3379_v11 = vcombine.low %v1087_v4, %v1091_v39  ;;  %v1143_v4 = vld [vmem:[#allocation10 + $0x2d0] sm:$0xff] }
 0x3b5   :  { %v3390_v54 = vcombine.high %v1096_v10, %v1100_v53  ;;  %v1147_v39 = vld [vmem:[#allocation10 + $0x2f0] sm:$0xff] }
 0x3b7   :  { %2701 = vmatpush1.bf16.msra.mxu0 %v3583_v14  ;;  %2783 = vmatpush1.bf16.msra.mxu1 %v3585_v15  ;;  %v1104_v14 = vld [vmem:[#allocation10 + $0x198] sm:$0xff] }
 0x3b8   :  { %2702 = vmatprep.subr.bf16.mxu0 %v3592_v16  ;;  %2784 = vmatprep.subr.bf16.mxu1 %v3594_v17  ;;  %v1108_v15 = vld [vmem:[#allocation10 + $0x1b8] sm:$0xff]  ;;  %v3387_v16 = vcombine.low %v1095_v6, %v1099_v7  ;;  %v3389_v17 = vcombine.low %v1096_v10, %v1100_v53  ;;  %v1151_v6 = vld [vmem:[#allocation10 + $0x310] sm:$0xff] }
 0x3b9   :  { %v3398_v19 = vcombine.high %v1104_v14, %v1108_v15  ;;  %v1155_v7 = vld [vmem:[#allocation10 + $0x330] sm:$0xff]  ;;  %v1152_v10 = vld [vmem:[#allocation10 + $0x318] sm:$0xff] }
 0x3ba   :  { %v1156_v53 = vld [vmem:[#allocation10 + $0x338] sm:$0xff] }
 0x3bb   :  { %2703 = vmatpush1.bf16.msra.mxu0 %v3591_v24  ;;  %2785 = vmatpush1.bf16.msra.mxu1 %v3593_v25  ;;  %v1116_v24 = vld [vmem:[#allocation10 + $0x1f8] sm:$0xff]  ;;  %v3395_v25 = vcombine.low %v1103_v45, %v1107_v9  ;;  %v1159_v45 = vld [vmem:[#allocation10 + $0x350] sm:$0xff] }
 0x3bc   :  { %2795 = vmatprep.subr.bf16.mxu0 %v3348_v26  ;;  %2877 = vmatprep.subr.bf16.mxu1 %v3350_v27  ;;  %v3397_v26 = vcombine.low %v1104_v14, %v1108_v15  ;;  %v3404_v27 = vcombine.high %v1111_v21, %v1115_v22  ;;  %v3406_v28 = vcombine.high %v1112_v23, %v1116_v24  ;;  %v1163_v9 = vld [vmem:[#allocation10 + $0x370] sm:$0xff]  ;;  %v1160_v14 = vld [vmem:[#allocation10 + $0x358] sm:$0xff] }
 0x3bd   :  { %v1164_v15 = vld [vmem:[#allocation10 + $0x378] sm:$0xff] }
 0x3be   :  { %2705 = vmatmul.mubr.bf16.vlgmr.msra.gmra.mrb[8].mxu0 %v4222_v63  ;;  %2787 = vmatmul.mubr.bf16.vlgmr.msra.gmra.mrb[8].mxu1 %v4222_v63 }
 0x3bf   :  { %2796 = vmatpush1.bf16.msra.mxu0 %v3347_v62  ;;  %2827 = vmatprep.mubr.bf16.mxu0 %v4201_v8  ;;  %v3403_v62 = vcombine.low %v1111_v21, %v1115_v22  ;;  %v1167_v21 = vld [vmem:[#allocation10 + $0x390] sm:$0xff] }
 0x3c0   :  { %2878 = vmatpush1.bf16.msra.mxu1 %v3349_v29  ;;  %2909 = vmatprep.mubr.bf16.mxu1 %v4201_v8  ;;  %v1088_v8 = vld [vmem:[#allocation10 + $0x118] sm:$0xff]  ;;  %v3405_v29 = vcombine.low %v1112_v23, %v1116_v24  ;;  %v1171_v22 = vld [vmem:[#allocation10 + $0x3b0] sm:$0xff] }
 0x3c1   :  { %2797 = vmatprep.subr.bf16.mxu0 %v3356_v30  ;;  %2879 = vmatprep.subr.bf16.mxu1 %v3358_v31  ;;  %v3382_v52 = vcombine.high %v1088_v8, %v1092_v50  ;;  %v3381_v12 = vcombine.low %v1088_v8, %v1092_v50  ;;  %v3412_v30 = vcombine.high %v1119_v57, %v1123_v58  ;;  %v1144_v8 = vld [vmem:[#allocation10 + $0x2d8] sm:$0xff] }
 0x3c2   :  { %v3414_v31 = vcombine.high %v1120_v59, %v1124_v61  ;;  %v1148_v50 = vld [vmem:[#allocation10 + $0x2f8] sm:$0xff] }
 0x3c3   :  { %2798 = vmatpush1.bf16.msra.mxu0 %v3355_v35  ;;  %v3411_v35 = vcombine.low %v1119_v57, %v1123_v58  ;;  %v1168_v23 = vld [vmem:[#allocation10 + $0x398] sm:$0xff]  ;;  %v1175_v57 = vld [vmem:[#allocation10 + $0x3d0] sm:$0xff] }
 0x3c4   :  { %2880 = vmatpush1.bf16.msra.mxu1 %v3357_v36  ;;  %2799 = vmatprep.subr.bf16.mxu0 %v3364_v37  ;;  %v3413_v36 = vcombine.low %v1120_v59, %v1124_v61  ;;  %v3420_v37 = vcombine.high %v1127_v32, %v1131_v33  ;;  %v1172_v24 = vld [vmem:[#allocation10 + $0x3b8] sm:$0xff]  ;;  %v1179_v58 = vld [vmem:[#allocation10 + $0x3f0] sm:$0xff] }
 0x3c5   :  { %2881 = vmatprep.subr.bf16.mxu1 %v3366_v38  ;;  %v3422_v38 = vcombine.high %v1128_v42, %v1132_v34  ;;  %v1176_v59 = vld [vmem:[#allocation10 + $0x3d8] sm:$0xff] }
 0x3c6   :  { %v1180_v61 = vld [vmem:[#allocation10 + $0x3f8] sm:$0xff] }
 0x3c7   :  { %2800 = vmatpush1.bf16.msra.mxu0 %v3363_v56  ;;  %v3419_v56 = vcombine.low %v1127_v32, %v1131_v33  ;;  %v1183_v32 = vld [vmem:[#allocation10 + $0x410] sm:$0xff] }
 0x3c8   :  { %2882 = vmatpush1.bf16.msra.mxu1 %v3365_v60  ;;  %2801 = vmatprep.subr.bf16.mxu0 %v3372_v0  ;;  %v3421_v60 = vcombine.low %v1128_v42, %v1132_v34  ;;  %v3428_v0 = vcombine.high %v1135_v43, %v1139_v46  ;;  %v1187_v33 = vld [vmem:[#allocation10 + $0x430] sm:$0xff]  ;;  %v1184_v42 = vld [vmem:[#allocation10 + $0x418] sm:$0xff] }
 0x3c9   :  { %2883 = vmatprep.subr.bf16.mxu1 %v3374_v2  ;;  %v3430_v2 = vcombine.high %v1136_v47, %v1140_v55  ;;  %v1188_v34 = vld [vmem:[#allocation10 + $0x438] sm:$0xff] }
 0x3cb   :  { %2802 = vmatpush1.bf16.msra.mxu0 %v3371_v40  ;;  %v3427_v40 = vcombine.low %v1135_v43, %v1139_v46  ;;  %v1191_v43 = vld [vmem:[#allocation10 + $0x450] sm:$0xff] }
 0x3cc   :  { %2884 = vmatpush1.bf16.msra.mxu1 %v3373_v5  ;;  %2803 = vmatprep.subr.bf16.mxu0 %v3380_v41  ;;  %v3429_v5 = vcombine.low %v1136_v47, %v1140_v55  ;;  %v3436_v41 = vcombine.high %v1143_v4, %v1147_v39  ;;  %v1195_v46 = vld [vmem:[#allocation10 + $0x470] sm:$0xff]  ;;  %v3475_v47 = vcombine.low %v1183_v32, %v1187_v33  ;;  %v1192_v55 = vld [vmem:[#allocation10 + $0x458] sm:$0xff] }
 0x3cd   :  { %2885 = vmatprep.subr.bf16.mxu1 %v3382_v52  ;;  %v3438_v52 = vcombine.high %v1144_v8, %v1148_v50 }
 0x3cf   :  { %2804 = vmatpush1.bf16.msra.mxu0 %v3379_v11  ;;  %v3435_v11 = vcombine.low %v1143_v4, %v1147_v39  ;;  %v1203_v4 = vld [vmem:[#allocation10 + $0x4b0] sm:$0xff] }
 0x3d0   :  { %2886 = vmatpush1.bf16.msra.mxu1 %v3381_v12  ;;  %2805 = vmatprep.subr.bf16.mxu0 %v3388_v44  ;;  %v3437_v12 = vcombine.low %v1144_v8, %v1148_v50  ;;  %v3444_v44 = vcombine.high %v1151_v6, %v1155_v7  ;;  %v1200_v8 = vld [vmem:[#allocation10 + $0x498] sm:$0xff] }
 0x3d1   :  { %2887 = vmatprep.subr.bf16.mxu1 %v3390_v54  ;;  %v3446_v54 = vcombine.high %v1152_v10, %v1156_v53  ;;  %v1204_v50 = vld [vmem:[#allocation10 + $0x4b8] sm:$0xff] }
 0x3d3   :  { %2806 = vmatpush1.bf16.msra.mxu0 %v3387_v16  ;;  %v3443_v16 = vcombine.low %v1151_v6, %v1155_v7  ;;  %v1207_v6 = vld [vmem:[#allocation10 + $0x4d0] sm:$0xff] }
 0x3d4   :  { %2888 = vmatpush1.bf16.msra.mxu1 %v3389_v17  ;;  %2807 = vmatprep.subr.bf16.mxu0 %v3396_v18  ;;  %v3445_v17 = vcombine.low %v1152_v10, %v1156_v53  ;;  %v3452_v18 = vcombine.high %v1159_v45, %v1163_v9  ;;  %v1211_v7 = vld [vmem:[#allocation10 + $0x4f0] sm:$0xff]  ;;  %v1208_v10 = vld [vmem:[#allocation10 + $0x4d8] sm:$0xff] }
 0x3d5   :  { %2889 = vmatprep.subr.bf16.mxu1 %v3398_v19  ;;  %v3454_v19 = vcombine.high %v1160_v14, %v1164_v15  ;;  %v1212_v53 = vld [vmem:[#allocation10 + $0x4f8] sm:$0xff] }
 0x3d7   :  { %2808 = vmatpush1.bf16.msra.mxu0 %v3395_v25  ;;  %v3451_v25 = vcombine.low %v1159_v45, %v1163_v9  ;;  %v1219_v45 = vld [vmem:[#allocation10 + $0x530] sm:$0xff]  ;;  %v1216_v9 = vld [vmem:[#allocation10 + $0x518] sm:$0xff] }
 0x3d8   :  { %2890 = vmatpush1.bf16.msra.mxu1 %v3397_v26  ;;  %2809 = vmatprep.subr.bf16.mxu0 %v3404_v27  ;;  %v3453_v26 = vcombine.low %v1160_v14, %v1164_v15  ;;  %v3460_v27 = vcombine.high %v1167_v21, %v1171_v22  ;;  %v1220_v14 = vld [vmem:[#allocation10 + $0x538] sm:$0xff]  ;;  %v3501_v15 = vcombine.low %v1208_v10, %v1212_v53 }
 0x3d9   :  { %2891 = vmatprep.subr.bf16.mxu1 %v3406_v28  ;;  %v3462_v28 = vcombine.high %v1168_v23, %v1172_v24 }
 0x3db   :  { %2810 = vmatpush1.bf16.msra.mxu0 %v3403_v62  ;;  %v3459_v62 = vcombine.low %v1167_v21, %v1171_v22  ;;  %v1224_v21 = vld [vmem:[#allocation10 + $0x558] sm:$0xff] }
 0x3dc   :  { %2892 = vmatpush1.bf16.msra.mxu1 %v3405_v29  ;;  %2811 = vmatprep.subr.bf16.mxu0 %v3412_v30  ;;  %v3461_v29 = vcombine.low %v1168_v23, %v1172_v24  ;;  %v3468_v30 = vcombine.high %v1175_v57, %v1179_v58  ;;  %v1228_v22 = vld [vmem:[#allocation10 + $0x578] sm:$0xff]  ;;  %v3509_v24 = vcombine.low %v1216_v9, %v1220_v14 }
 0x3dd   :  { %2893 = vmatprep.subr.bf16.mxu1 %v3414_v31  ;;  %v3470_v31 = vcombine.high %v1176_v59, %v1180_v61 }
 0x3df   :  { %2812 = vmatpush1.bf16.msra.mxu0 %v3411_v35  ;;  %v3467_v35 = vcombine.low %v1175_v57, %v1179_v58  ;;  %v1232_v57 = vld [vmem:[#allocation10 + $0x598] sm:$0xff] }
 0x3e0   :  { %2894 = vmatpush1.bf16.msra.mxu1 %v3413_v36  ;;  %2813 = vmatprep.subr.bf16.mxu0 %v3420_v37  ;;  %v3469_v36 = vcombine.low %v1176_v59, %v1180_v61  ;;  %v3476_v37 = vcombine.high %v1183_v32, %v1187_v33  ;;  %v1236_v58 = vld [vmem:[#allocation10 + $0x5b8] sm:$0xff]  ;;  %v3517_v61 = vcombine.low %v1224_v21, %v1228_v22 }
 0x3e1   :  { %2895 = vmatprep.subr.bf16.mxu1 %v3422_v38  ;;  %v3478_v38 = vcombine.high %v1184_v42, %v1188_v34  ;;  %v1240_v32 = vld [vmem:[#allocation10 + $0x5d8] sm:$0xff] }
 0x3e2   :  { %v1244_v33 = vld [vmem:[#allocation10 + $0x5f8] sm:$0xff] }
 0x3e3   :  { %2814 = vmatpush1.bf16.msra.mxu0 %v3419_v56  ;;  %v1196_v56 = vld [vmem:[#allocation10 + $0x478] sm:$0xff] }
 0x3e4   :  { %2896 = vmatpush1.bf16.msra.mxu1 %v3421_v60  ;;  %2815 = vmatprep.subr.bf16.mxu0 %v3428_v0  ;;  %v3477_v60 = vcombine.low %v1184_v42, %v1188_v34  ;;  %v3484_v0 = vcombine.high %v1191_v43, %v1195_v46  ;;  %v3486_v39 = vcombine.high %v1192_v55, %v1196_v56 }
 0x3e5   :  { %2897 = vmatprep.subr.bf16.mxu1 %v3430_v2  ;;  %v1199_v2 = vld [vmem:[#allocation10 + $0x490] sm:$0xff]  ;;  %v3525_v34 = vcombine.low %v1232_v57, %v1236_v58 }
 0x3e7   :  { %2816 = vmatpush1.bf16.msra.mxu0 %v3427_v40  ;;  %v3483_v40 = vcombine.low %v1191_v43, %v1195_v46  ;;  %v1248_v43 = vld [vmem:[#allocation10 + $0x618] sm:$0xff] }
 0x3e8   :  { %2898 = vmatpush1.bf16.msra.mxu1 %v3429_v5  ;;  %2817 = vmatprep.subr.bf16.mxu0 %v3436_v41  ;;  %v3485_v5 = vcombine.low %v1192_v55, %v1196_v56  ;;  %v3492_v41 = vcombine.high %v1199_v2, %v1203_v4  ;;  %v1252_v46 = vld [vmem:[#allocation10 + $0x638] sm:$0xff]  ;;  %v3533_v55 = vcombine.low %v1240_v32, %v1244_v33 }
 0x3e9   :  { %2899 = vmatprep.subr.bf16.mxu1 %v3438_v52  ;;  %v3494_v52 = vcombine.high %v1200_v8, %v1204_v50 }
 0x3eb   :  { %2818 = vmatpush1.bf16.msra.mxu0 %v3435_v11  ;;  %v3491_v11 = vcombine.low %v1199_v2, %v1203_v4  ;;  %v1259_v2 = vld [vmem:[#allocation10 + $0x670] sm:$0xff]  ;;  %v1256_v4 = vld [vmem:[#allocation10 + $0x658] sm:$0xff] }
 0x3ec   :  { %2900 = vmatpush1.bf16.msra.mxu1 %v3437_v12  ;;  %2819 = vmatprep.subr.bf16.mxu0 %v3444_v44  ;;  %v3500_v12 = vcombine.high %v1207_v6, %v1211_v7  ;;  %v3502_v44 = vcombine.high %v1208_v10, %v1212_v53 }
 0x3ed   :  { %2901 = vmatprep.subr.bf16.mxu1 %v3446_v54  ;;  %v1215_v54 = vld [vmem:[#allocation10 + $0x510] sm:$0xff] }
 0x3ee   :  { %v3507_v23 = vcombine.low %v1215_v54, %v1219_v45 }
 0x3ef   :  { %2820 = vmatpush1.bf16.msra.mxu0 %v3443_v16  ;;  %v3508_v16 = vcombine.high %v1215_v54, %v1219_v45  ;;  %v1272_v54 = vld [vmem:[#allocation10 + $0x6d8] sm:$0xff] }
 0x3f0   :  { %2902 = vmatpush1.bf16.msra.mxu1 %v3445_v17  ;;  %2821 = vmatprep.subr.bf16.mxu0 %v3452_v18  ;;  %v3510_v17 = vcombine.high %v1216_v9, %v1220_v14  ;;  %v1223_v18 = vld [vmem:[#allocation10 + $0x550] sm:$0xff]  ;;  %v1276_v45 = vld [vmem:[#allocation10 + $0x6f8] sm:$0xff] }
 0x3f1   :  { %2903 = vmatprep.subr.bf16.mxu1 %v3454_v19  ;;  %v1227_v19 = vld [vmem:[#allocation10 + $0x570] sm:$0xff] }
 0x3f2   :  { %v3515_v59 = vcombine.low %v1223_v18, %v1227_v19 }
 0x3f3   :  { %2822 = vmatpush1.bf16.msra.mxu0 %v3451_v25  ;;  %v3516_v25 = vcombine.high %v1223_v18, %v1227_v19  ;;  %v1280_v18 = vld [vmem:[#allocation10 + $0x718] sm:$0xff] }
 0x3f4   :  { %2904 = vmatpush1.bf16.msra.mxu1 %v3453_v26  ;;  %2823 = vmatprep.subr.bf16.mxu0 %v3460_v27  ;;  %v3518_v26 = vcombine.high %v1224_v21, %v1228_v22  ;;  %v1231_v27 = vld [vmem:[#allocation10 + $0x590] sm:$0xff]  ;;  %v1284_v19 = vld [vmem:[#allocation10 + $0x738] sm:$0xff]  ;;  %v3565_v22 = vcombine.low %v1272_v54, %v1276_v45 }
 0x3f5   :  { %2905 = vmatprep.subr.bf16.mxu1 %v3462_v28  ;;  %v1235_v28 = vld [vmem:[#allocation10 + $0x5b0] sm:$0xff] }
 0x3f6   :  { %v3523_v42 = vcombine.low %v1231_v27, %v1235_v28 }
 0x3f7   :  { %2824 = vmatpush1.bf16.msra.mxu0 %v3459_v62  ;;  %v3524_v62 = vcombine.high %v1231_v27, %v1235_v28  ;;  %v1288_v27 = vld [vmem:[#allocation10 + $0x758] sm:$0xff] }
 0x3f8   :  { %2906 = vmatpush1.bf16.msra.mxu1 %v3461_v29  ;;  %2825 = vmatprep.subr.bf16.mxu0 %v3468_v30  ;;  %v3526_v29 = vcombine.high %v1232_v57, %v1236_v58  ;;  %v1239_v30 = vld [vmem:[#allocation10 + $0x5d0] sm:$0xff]  ;;  %v1292_v28 = vld [vmem:[#allocation10 + $0x778] sm:$0xff]  ;;  %v3573_v58 = vcombine.low %v1280_v18, %v1284_v19 }
 0x3f9   :  { %2907 = vmatprep.subr.bf16.mxu1 %v3470_v31  ;;  %v1243_v31 = vld [vmem:[#allocation10 + $0x5f0] sm:$0xff] }
 0x3fb   :  { %2826 = vmatpush1.bf16.msra.mxu0 %v3467_v35  ;;  %v3532_v35 = vcombine.high %v1239_v30, %v1243_v31 }
 0x3fc   :  { %2908 = vmatpush1.bf16.msra.mxu1 %v3469_v36  ;;  %2836 = vmatprep.subr.bf16.mxu0 %v3476_v37  ;;  %v3534_v36 = vcombine.high %v1240_v32, %v1244_v33  ;;  %v1247_v37 = vld [vmem:[#allocation10 + $0x610] sm:$0xff]  ;;  %v3581_v33 = vcombine.low %v1288_v27, %v1292_v28 }
 0x3fd   :  { %2918 = vmatprep.subr.bf16.mxu1 %v3478_v38  ;;  %v1251_v38 = vld [vmem:[#allocation10 + $0x630] sm:$0xff] }
 0x3fe   :  { %2828 = vmatmul.mubr.bf16.vlgmr.msra.gmra.mrb[12].mxu0 %v4203_v13  ;;  %v3540_v56 = vcombine.high %v1247_v37, %v1251_v38 }
 0x3ff   :  { %2910 = vmatmul.mubr.bf16.vlgmr.msra.gmra.mrb[12].mxu1 %v4203_v13  ;;  %2837 = vmatpush1.bf16.msra.mxu0 %v3475_v47  ;;  %v3493_v13 = vcombine.low %v1200_v8, %v1204_v50  ;;  %v3531_v47 = vcombine.low %v1239_v30, %v1243_v31  ;;  %v3539_v8 = vcombine.low %v1247_v37, %v1251_v38  ;;  %v1296_v30 = vld [vmem:[#allocation10 + $0x798] sm:$0xff] }
 0x400   :  { %2868 = vmatprep.mubr.bf16.mxu0 %v4209_v20  ;;  %2919 = vmatpush1.bf16.msra.mxu1 %v3477_v60  ;;  %v3542_v60 = vcombine.high %v1248_v43, %v1252_v46  ;;  %v3541_v50 = vcombine.low %v1248_v43, %v1252_v46  ;;  %v1300_v31 = vld [vmem:[#allocation10 + $0x7b8] sm:$0xff] }
 0x401   :  { %2950 = vmatprep.mubr.bf16.mxu1 %v4209_v20  ;;  %2838 = vmatprep.subr.bf16.mxu0 %v3484_v0  ;;  %v3499_v20 = vcombine.low %v1207_v6, %v1211_v7  ;;  %v1255_v0 = vld [vmem:[#allocation10 + $0x650] sm:$0xff]  ;;  %v1264_v6 = vld [vmem:[#allocation10 + $0x698] sm:$0xff]  ;;  %v3589_v46 = vcombine.low %v1296_v30, %v1300_v31 }
 0x402   :  { %2920 = vmatprep.subr.bf16.mxu1 %v3486_v39  ;;  %v1260_v39 = vld [vmem:[#allocation10 + $0x678] sm:$0xff]  ;;  %v3547_v10 = vcombine.low %v1255_v0, %v1259_v2 }
 0x403   :  { %2839 = vmatpush1.bf16.msra.mxu0 %v3483_v40  ;;  %v3548_v40 = vcombine.high %v1255_v0, %v1259_v2  ;;  %v1268_v7 = vld [vmem:[#allocation10 + $0x6b8] sm:$0xff]  ;;  %v3549_v53 = vcombine.low %v1256_v4, %v1260_v39 }
 0x404   :  { %2921 = vmatpush1.bf16.msra.mxu1 %v3485_v5  ;;  %2840 = vmatprep.subr.bf16.mxu0 %v3492_v41  ;;  %v3550_v5 = vcombine.high %v1256_v4, %v1260_v39  ;;  %v1263_v41 = vld [vmem:[#allocation10 + $0x690] sm:$0xff]  ;;  %v3557_v14 = vcombine.low %v1264_v6, %v1268_v7  ;;  %v1304_v37 = vld [vmem:[#allocation10 + $0x7d8] sm:$0xff] }
 0x405   :  { %2922 = vmatprep.subr.bf16.mxu1 %v3494_v52  ;;  %v1267_v52 = vld [vmem:[#allocation10 + $0x6b0] sm:$0xff]  ;;  %v1308_v38 = vld [vmem:[#allocation10 + $0x7f8] sm:$0xff] }
 0x406   :  { %v3555_v9 = vcombine.low %v1263_v41, %v1267_v52  ;;  %v4234_v0 = vld [vmem:[#allocation11 + $0x13] sm:$0xff] }
 0x407   :  { %2841 = vmatpush1.bf16.msra.mxu0 %v3491_v11  ;;  %v3556_v11 = vcombine.high %v1263_v41, %v1267_v52  ;;  %v1314_v2 = vrot.slane %v4234_v0, %v4148_v49  ;;  %v1322_v4 = vrot.slane %v4234_v0, %v4182_v1  ;;  %v1318_v39 = vrot.slane %v4234_v0, %v4151_v51 }
 0x408   :  { %2923 = vmatpush1.bf16.msra.mxu1 %v3493_v13  ;;  %2842 = vmatprep.subr.bf16.mxu0 %v3500_v12  ;;  %v3558_v13 = vcombine.high %v1264_v6, %v1268_v7  ;;  %v1271_v12 = vld [vmem:[#allocation10 + $0x6d0] sm:$0xff] }
 0x409   :  { %2924 = vmatprep.subr.bf16.mxu1 %v3502_v44  ;;  %v1275_v44 = vld [vmem:[#allocation10 + $0x6f0] sm:$0xff] }
 0x40a   :  { %v3563_v21 = vcombine.low %v1271_v12, %v1275_v44 }
 0x40b   :  { %2843 = vmatpush1.bf16.msra.mxu0 %v3499_v20  ;;  %v3564_v20 = vcombine.high %v1271_v12, %v1275_v44 }
 0x40c   :  { %2925 = vmatpush1.bf16.msra.mxu1 %v3501_v15  ;;  %2844 = vmatprep.subr.bf16.mxu0 %v3508_v16  ;;  %v3566_v15 = vcombine.high %v1272_v54, %v1276_v45  ;;  %v1279_v16 = vld [vmem:[#allocation10 + $0x710] sm:$0xff] }
 0x40d   :  { %2926 = vmatprep.subr.bf16.mxu1 %v3510_v17  ;;  %v1283_v17 = vld [vmem:[#allocation10 + $0x730] sm:$0xff] }
 0x40e   :  { %v3571_v57 = vcombine.low %v1279_v16, %v1283_v17 }
 0x40f   :  { %2845 = vmatpush1.bf16.msra.mxu0 %v3507_v23  ;;  %v3572_v23 = vcombine.high %v1279_v16, %v1283_v17 }
 0x410   :  { %2927 = vmatpush1.bf16.msra.mxu1 %v3509_v24  ;;  %2846 = vmatprep.subr.bf16.mxu0 %v3516_v25  ;;  %v3574_v24 = vcombine.high %v1280_v18, %v1284_v19  ;;  %v1287_v25 = vld [vmem:[#allocation10 + $0x750] sm:$0xff] }
 0x411   :  { %2928 = vmatprep.subr.bf16.mxu1 %v3518_v26  ;;  %v1291_v26 = vld [vmem:[#allocation10 + $0x770] sm:$0xff] }
 0x412   :  { %v3579_v32 = vcombine.low %v1287_v25, %v1291_v26 }
 0x413   :  { %2847 = vmatpush1.bf16.msra.mxu0 %v3515_v59  ;;  %v3580_v59 = vcombine.high %v1287_v25, %v1291_v26 }
 0x414   :  { %2929 = vmatpush1.bf16.msra.mxu1 %v3517_v61  ;;  %2848 = vmatprep.subr.bf16.mxu0 %v3524_v62  ;;  %v3582_v61 = vcombine.high %v1288_v27, %v1292_v28  ;;  %v1295_v62 = vld [vmem:[#allocation10 + $0x790] sm:$0xff] }
 0x415   :  { %2930 = vmatprep.subr.bf16.mxu1 %v3526_v29  ;;  %v1299_v29 = vld [vmem:[#allocation10 + $0x7b0] sm:$0xff] }
 0x416   :  { %v3587_v43 = vcombine.low %v1295_v62, %v1299_v29 }
 0x417   :  { %2849 = vmatpush1.bf16.msra.mxu0 %v3523_v42  ;;  %v3588_v42 = vcombine.high %v1295_v62, %v1299_v29 }
 0x418   :  { %2931 = vmatpush1.bf16.msra.mxu1 %v3525_v34  ;;  %2850 = vmatprep.subr.bf16.mxu0 %v3532_v35  ;;  %v3590_v34 = vcombine.high %v1296_v30, %v1300_v31  ;;  %v1303_v35 = vld [vmem:[#allocation10 + $0x7d0] sm:$0xff] }
 0x419   :  { %2932 = vmatprep.subr.bf16.mxu1 %v3534_v36  ;;  %v1307_v36 = vld [vmem:[#allocation10 + $0x7f0] sm:$0xff] }
 0x41b   :  { %2851 = vmatpush1.bf16.msra.mxu0 %v3531_v47  ;;  %v3596_v47 = vcombine.high %v1303_v35, %v1307_v36 }
 0x41c   :  { %2933 = vmatpush1.bf16.msra.mxu1 %v3533_v55  ;;  %2852 = vmatprep.subr.bf16.mxu0 %v3540_v56  ;;  %v3598_v55 = vcombine.high %v1304_v37, %v1308_v38  ;;  %v3595_v56 = vcombine.low %v1303_v35, %v1307_v36 }
 0x41d   :  { %2934 = vmatprep.subr.bf16.mxu1 %v3542_v60  ;;  %v3597_v60 = vcombine.low %v1304_v37, %v1308_v38 }
 0x41f   :  { %2853 = vmatpush1.bf16.msra.mxu0 %v3539_v8  ;;  %v1326_v8 = vrot.slane %v4234_v0, %v4185_v3 }
 0x420   :  { %2935 = vmatpush1.bf16.msra.mxu1 %v3541_v50  ;;  %2854 = vmatprep.subr.bf16.mxu0 %v3548_v40 }
 0x421   :  { %2936 = vmatprep.subr.bf16.mxu1 %v3550_v5 }
 0x423   :  { %2855 = vmatpush1.bf16.msra.mxu0 %v3547_v10 }
 0x424   :  { %2937 = vmatpush1.bf16.msra.mxu1 %v3549_v53  ;;  %2856 = vmatprep.subr.bf16.mxu0 %v3556_v11 }
 0x425   :  { %2938 = vmatprep.subr.bf16.mxu1 %v3558_v13 }
 0x427   :  { %2857 = vmatpush1.bf16.msra.mxu0 %v3555_v9 }
 0x428   :  { %2939 = vmatpush1.bf16.msra.mxu1 %v3557_v14  ;;  %2858 = vmatprep.subr.bf16.mxu0 %v3564_v20 }
 0x429   :  { %2940 = vmatprep.subr.bf16.mxu1 %v3566_v15 }
 0x42b   :  { %2859 = vmatpush1.bf16.msra.mxu0 %v3563_v21 }
 0x42c   :  { %2941 = vmatpush1.bf16.msra.mxu1 %v3565_v22  ;;  %2860 = vmatprep.subr.bf16.mxu0 %v3572_v23 }
 0x42d   :  { %2942 = vmatprep.subr.bf16.mxu1 %v3574_v24 }
 0x42f   :  { %2861 = vmatpush1.bf16.msra.mxu0 %v3571_v57 }
 0x430   :  { %2943 = vmatpush1.bf16.msra.mxu1 %v3573_v58  ;;  %2862 = vmatprep.subr.bf16.mxu0 %v3580_v59 }
 0x431   :  { %2944 = vmatprep.subr.bf16.mxu1 %v3582_v61 }
 0x433   :  { %2863 = vmatpush1.bf16.msra.mxu0 %v3579_v32 }
 0x434   :  { %2945 = vmatpush1.bf16.msra.mxu1 %v3581_v33  ;;  %2864 = vmatprep.subr.bf16.mxu0 %v3588_v42 }
 0x435   :  { %2946 = vmatprep.subr.bf16.mxu1 %v3590_v34 }
 0x437   :  { %2865 = vmatpush1.bf16.msra.mxu0 %v3587_v43 }
 0x438   :  { %2947 = vmatpush1.bf16.msra.mxu1 %v3589_v46  ;;  %2866 = vmatprep.subr.bf16.mxu0 %v3596_v47 }
 0x439   :  { %2948 = vmatprep.subr.bf16.mxu1 %v3598_v55 }
 0x43b   :  { %2867 = vmatpush1.bf16.msra.mxu0 %v3595_v56 }
 0x43c   :  { %2949 = vmatpush1.bf16.msra.mxu1 %v3597_v60 }
 0x43e   :  { %2869 = vmatmul.mubr.bf16.vlgmr.msra.gmra.mrb[12].mxu0 %v4222_v63 }
 0x43f   :  { %2951 = vmatmul.mubr.bf16.vlgmr.msra.gmra.mrb[12].mxu1 %v4222_v63 }
 0x491   :  { %v2706_v50 = vpop.f32.mrb[8].mxu0  ;;  %v2788_v40 = vpop.f32.mrb[8].mxu1 }
 0x492   :  { %v3639_v5 = vadd.f32 %v2706_v50, %v1314_v2  ;;  %v3641_v41 = vadd.f32 %v2788_v40, %v1322_v4  ;;  %v2708_v52 = vpop.f32.mrb[9].mxu0  ;;  %v2790_v63 = vpop.f32.mrb[9].mxu1 }
 0x493   :  { %v3640_v6 = vadd.f32 %v2708_v52, %v1318_v39  ;;  %v3642_v7 = vadd.f32 %v2790_v63, %v1326_v8  ;;  %v2710_v10 = vpop.f32.mrb[10].mxu0  ;;  %v2792_v53 = vpop.f32.mrb[10].mxu1 }
 0x494   :  { %v2959_v11 = vrot.slane %v3639_v5, 4  ;;  %v2971_v13 = vrot.slane %v3641_v41, 4  ;;  %v2711_v12 = vpop.f32.mrb[11].mxu0  ;;  %v2793_v44 = vpop.f32.mrb[11].mxu1 }
 0x495   :  { %v2965_v54 = vrot.slane %v3640_v6, 4  ;;  %v2977_v45 = vrot.slane %v3642_v7, 4 }
 0x496   :  { %v2960_v9 = vadd.f32 %v3639_v5, %v2959_v11  ;;  %v2972_v14 = vadd.f32 %v3641_v41, %v2971_v13 }
 0x497   :  { %v2966_v20 = vadd.f32 %v3640_v6, %v2965_v54  ;;  %v2978_v15 = vadd.f32 %v3642_v7, %v2977_v45 }
 0x498   :  { %v2961_v16 = vrot.slane %v2960_v9, 2  ;;  %v2973_v17 = vrot.slane %v2972_v14, 2 }
 0x499   :  { %v2967_v18 = vrot.slane %v2966_v20, 2  ;;  %v2979_v19 = vrot.slane %v2978_v15, 2 }
 0x49a   :  { %v2962_v21 = vadd.f32 %v2961_v16, %v2960_v9  ;;  %v2974_v22 = vadd.f32 %v2973_v17, %v2972_v14 }
 0x49b   :  { %v2968_v23 = vadd.f32 %v2967_v18, %v2966_v20  ;;  %v2980_v24 = vadd.f32 %v2979_v19, %v2978_v15  ;;  %v4244_v18 = vld [vmem:[#allocation11 + $0x1b] sm:$0xff]  ;;  %v4246_v19 = vld [vmem:[#allocation11 + $0x23] sm:$0xff] }
 0x49c   :  { %v2963_v25 = vrot.slane %v2962_v21, 1  ;;  %v2975_v26 = vrot.slane %v2974_v22, 1 }
 0x49d   :  { %v2969_v27 = vrot.slane %v2968_v23, 1  ;;  %v2981_v28 = vrot.slane %v2980_v24, 1 }
 0x49e   :  { %v2964_v57 = vadd.f32 %v2963_v25, %v2962_v21  ;;  %v2976_v58 = vadd.f32 %v2975_v26, %v2974_v22  ;;  %v3116_v21 = vrot.slane %v4244_v18, %v4148_v49  ;;  %v3166_v26 = vrot.slane %v4246_v19, %v4148_v49 }
 0x49f   :  { %v2970_v59 = vadd.f32 %v2969_v27, %v2968_v23  ;;  %v2982_v61 = vadd.f32 %v2981_v28, %v2980_v24  ;;  %v3124_v23 = vrot.slane %v4244_v18, %v4182_v1  ;;  %v3120_v27 = vrot.slane %v4244_v18, %v4151_v51 }
 0x4a0   :  { %v3007_v62 = vmul.f32 0.125, %v2964_v57  ;;  %v3009_v29 = vmul.f32 0.125, %v2976_v58  ;;  %v3174_v58 = vrot.slane %v4246_v19, %v4182_v1  ;;  %v3178_v49 = vrot.slane %v4246_v19, %v4185_v3 }
 0x4a1   :  { %v3008_v30 = vmul.f32 0.125, %v2970_v59  ;;  %v3010_v31 = vmul.f32 0.125, %v2982_v61  ;;  %v3128_v59 = vrot.slane %v4244_v18, %v4185_v3 }
 0x4a2   :  { %v3015_v32 = vsub.f32 %v3639_v5, %v3007_v62  ;;  %v3017_v33 = vsub.f32 %v3641_v41, %v3009_v29 }
 0x4a3   :  { %v3016_v42 = vsub.f32 %v3640_v6, %v3008_v30  ;;  %v3018_v34 = vsub.f32 %v3642_v7, %v3010_v31  ;;  %v3170_v30 = vrot.slane %v4246_v19, %v4151_v51 }
 0x4a4   :  { %v3023_v35 = vmul.f32 %v3015_v32, %v3015_v32  ;;  %v3025_v36 = vmul.f32 %v3017_v33, %v3017_v33 }
 0x4a5   :  { %v3024_v37 = vmul.f32 %v3016_v42, %v3016_v42  ;;  %v3026_v38 = vmul.f32 %v3018_v34, %v3018_v34 }
 0x4a6   :  { %v3031_v43 = vrot.slane %v3023_v35, 4  ;;  %v3043_v46 = vrot.slane %v3025_v36, 4 }
 0x4a7   :  { %v3037_v47 = vrot.slane %v3024_v37, 4  ;;  %v3049_v55 = vrot.slane %v3026_v38, 4 }
 0x4a8   :  { %v3032_v56 = vadd.f32 %v3031_v43, %v3023_v35  ;;  %v3044_v60 = vadd.f32 %v3043_v46, %v3025_v36 }
 0x4a9   :  { %v3038_v2 = vadd.f32 %v3037_v47, %v3024_v37  ;;  %v3050_v4 = vadd.f32 %v3049_v55, %v3026_v38 }
 0x4aa   :  { %v3033_v39 = vrot.slane %v3032_v56, 2  ;;  %v3045_v8 = vrot.slane %v3044_v60, 2 }
 0x4ab   :  { %v3039_v50 = vrot.slane %v3038_v2, 2  ;;  %v3051_v40 = vrot.slane %v3050_v4, 2 }
 0x4ac   :  { %v3034_v5 = vadd.f32 %v3033_v39, %v3032_v56  ;;  %v3046_v41 = vadd.f32 %v3045_v8, %v3044_v60  ;;  %v4265_v56 = vsub.s32 4, %v4145_v48  ;;  %v4268_v60 = vsub.s32 6, %v4145_v48 }
 0x4ad   :  { %v3040_v52 = vadd.f32 %v3039_v50, %v3038_v2  ;;  %v3052_v63 = vadd.f32 %v3051_v40, %v3050_v4  ;;  %v4271_v2 = vsub.s32 5, %v4145_v48  ;;  %v4274_v4 = vsub.s32 7, %v4145_v48 }
 0x4ae   :  { %v3035_v6 = vrot.slane %v3034_v5, 1  ;;  %v3047_v7 = vrot.slane %v3046_v41, 1  ;;  %v1330_v39 = vrot.slane %v4234_v0, %v4265_v56  ;;  %v1338_v8 = vrot.slane %v4234_v0, %v4268_v60 }
 0x4af   :  { %v3041_v10 = vrot.slane %v3040_v52, 1  ;;  %v3053_v53 = vrot.slane %v3052_v63, 1  ;;  %v1334_v50 = vrot.slane %v4234_v0, %v4271_v2  ;;  %v1342_v40 = vrot.slane %v4234_v0, %v4274_v4 }
 0x4b0   :  { %v3036_v11 = vadd.f32 %v3035_v6, %v3034_v5  ;;  %v3048_v13 = vadd.f32 %v3047_v7, %v3046_v41 }
 0x4b1   :  { %v3042_v12 = vadd.f32 %v3041_v10, %v3040_v52  ;;  %v3054_v44 = vadd.f32 %v3053_v53, %v3052_v63 }
 0x4b2   :  { %v3079_v54 = vmul.f32 0.125, %v3036_v11  ;;  %v3081_v45 = vmul.f32 0.125, %v3048_v13 }
 0x4b3   :  { %v3080_v9 = vmul.f32 0.125, %v3042_v12  ;;  %v3082_v14 = vmul.f32 0.125, %v3054_v44 }
 0x4b4   :  { %v3087_v20 = vadd.f32 0.8, %v3079_v54  ;;  %v3089_v15 = vadd.f32 0.8, %v3081_v45 }
 0x4b5   :  { %v3088_v16 = vadd.f32 0.8, %v3080_v9  ;;  %v3090_v17 = vadd.f32 0.8, %v3082_v14 }
 0x4b6   :  { %3812 = vrsqrt.f32 %v3087_v20 }
 0x4b7   :  { %3814 = vrsqrt.f32 %v3089_v15 }
 0x4b8   :  { %3816 = vrsqrt.f32 %v3088_v16 }
 0x4b9   :  { %3818 = vrsqrt.f32 %v3090_v17 }
 0x4c0   :  { %v3813_v22 = vpop.eup %3812 }
 0x4c1   :  { %v3815_v24 = vpop.eup %3814  ;;  %v3103_v25 = vmul.f32 %v3813_v22, %v3015_v32 }
 0x4c2   :  { %v3817_v28 = vpop.eup %3816  ;;  %v3105_v57 = vmul.f32 %v3815_v24, %v3017_v33 }
 0x4c3   :  { %v3819_v61 = vpop.eup %3818  ;;  %v3153_v62 = vmul.f32 %v3116_v21, %v3103_v25  ;;  %v3104_v29 = vmul.f32 %v3817_v28, %v3016_v42 }
 0x4c4   :  { %v3155_v31 = vmul.f32 %v3124_v23, %v3105_v57  ;;  %v3106_v32 = vmul.f32 %v3819_v61, %v3018_v34 }
 0x4c5   :  { %v3203_v35 = vadd.f32 %v3166_v26, %v3153_v62  ;;  %v3154_v36 = vmul.f32 %v3120_v27, %v3104_v29 }
 0x4c6   :  { %v3205_v33 = vadd.f32 %v3174_v58, %v3155_v31  ;;  %v3156_v37 = vmul.f32 %v3128_v59, %v3106_v32 }
 0x4c7   :  { %vm3211_vm9 = vcmp.gt.f32.partialorder %v3203_v35, 0.0  ;;  %v3219_v1 = vmul.f32 0.2, %v3203_v35  ;;  %v3204_v38 = vadd.f32 %v3170_v30, %v3154_v36 }
 0x4c8   :  { %vm3213_vm10 = vcmp.gt.f32.partialorder %v3205_v33, 0.0  ;;  %v3221_v43 = vmul.f32 0.2, %v3205_v33  ;;  %v3206_v46 = vadd.f32 %v3178_v49, %v3156_v37 }
 0x4c9   :  { %v3227_v47 = vsel %vm3211_vm9, %v3203_v35, %v3219_v1  ;;  %vm3212_vm11 = vcmp.gt.f32.partialorder %v3204_v38, 0.0  ;;  %v3220_v42 = vmul.f32 0.2, %v3204_v38 }
 0x4ca   :  { %3235 = vst [vmem:[#allocation13] sm:$0xff] %v3227_v47  ;;  %v3229_v51 = vsel %vm3213_vm10, %v3205_v33, %v3221_v43  ;;  %vm3214_vm12 = vcmp.gt.f32.partialorder %v3206_v46, 0.0  ;;  %v3222_v34 = vmul.f32 0.2, %v3206_v46 }
 0x4cb   :  { %3237 = vst [vmem:[#allocation13 + $0x10] sm:$0xff] %v3229_v51  ;;  %v3228_v55 = vsel %vm3212_vm11, %v3204_v38, %v3220_v42 }
 0x4cc   :  { %3236 = vst [vmem:[#allocation13 + $0x8] sm:$0xff] %v3228_v55  ;;  %v3230_v3 = vsel %vm3214_vm12, %v3206_v46, %v3222_v34 }
 0x4cd   :  { %3238 = vst [vmem:[#allocation13 + $0x18] sm:$0xff] %v3230_v3 }
 0x511   :  { %v2870_v5 = vpop.f32.mrb[12].mxu0 }
 0x512   :  { %v3643_v41 = vadd.f32 %v2870_v5, %v1330_v39  ;;  %v2952_v52 = vpop.f32.mrb[12].mxu1  ;;  %v2872_v63 = vpop.f32.mrb[13].mxu0 }
 0x513   :  { %v3645_v6 = vadd.f32 %v2952_v52, %v1338_v8  ;;  %v3644_v7 = vadd.f32 %v2872_v63, %v1334_v50  ;;  %v2954_v48 = vpop.f32.mrb[13].mxu1  ;;  %v2874_v10 = vpop.f32.mrb[14].mxu0 }
 0x514   :  { %v2983_v53 = vrot.slane %v3643_v41, 4  ;;  %v3646_v11 = vadd.f32 %v2954_v48, %v1342_v40  ;;  %v2956_v13 = vpop.f32.mrb[14].mxu1  ;;  %v2875_v12 = vpop.f32.mrb[15].mxu0 }
 0x515   :  { %v2995_v44 = vrot.slane %v3645_v6, 4  ;;  %v2989_v54 = vrot.slane %v3644_v7, 4  ;;  %v2957_v45 = vpop.f32.mrb[15].mxu1 }
 0x516   :  { %v2984_v9 = vadd.f32 %v3643_v41, %v2983_v53  ;;  %v3001_v14 = vrot.slane %v3646_v11, 4 }
 0x517   :  { %v2996_v20 = vadd.f32 %v3645_v6, %v2995_v44  ;;  %v2990_v15 = vadd.f32 %v3644_v7, %v2989_v54 }
 0x518   :  { %v2985_v0 = vrot.slane %v2984_v9, 2  ;;  %v3002_v16 = vadd.f32 %v3646_v11, %v3001_v14 }
 0x519   :  { %v2997_v17 = vrot.slane %v2996_v20, 2  ;;  %v2991_v21 = vrot.slane %v2990_v15, 2 }
 0x51a   :  { %v2986_v22 = vadd.f32 %v2985_v0, %v2984_v9  ;;  %v3003_v23 = vrot.slane %v3002_v16, 2 }
 0x51b   :  { %v2998_v24 = vadd.f32 %v2997_v17, %v2996_v20  ;;  %v2992_v25 = vadd.f32 %v2991_v21, %v2990_v15  ;;  %v3132_v21 = vrot.slane %v4244_v18, %v4265_v56 }
 0x51c   :  { %v2987_v26 = vrot.slane %v2986_v22, 1  ;;  %v3004_v27 = vadd.f32 %v3003_v23, %v3002_v16  ;;  %v3140_v23 = vrot.slane %v4244_v18, %v4268_v60 }
 0x51d   :  { %v2999_v28 = vrot.slane %v2998_v24, 1  ;;  %v2993_v57 = vrot.slane %v2992_v25, 1 }
 0x51e   :  { %v2988_v58 = vadd.f32 %v2987_v26, %v2986_v22  ;;  %v3005_v59 = vrot.slane %v3004_v27, 1  ;;  %v3182_v26 = vrot.slane %v4246_v19, %v4265_v56  ;;  %v3194_v56 = vrot.slane %v4246_v19, %v4274_v4 }
 0x51f   :  { %v3000_v61 = vadd.f32 %v2999_v28, %v2998_v24  ;;  %v2994_v62 = vadd.f32 %v2993_v57, %v2992_v25 }
 0x520   :  { %v3011_v29 = vmul.f32 0.125, %v2988_v58  ;;  %v3006_v30 = vadd.f32 %v3005_v59, %v3004_v27  ;;  %v3136_v27 = vrot.slane %v4244_v18, %v4271_v2  ;;  %v3190_v58 = vrot.slane %v4246_v19, %v4268_v60 }
 0x521   :  { %v3013_v31 = vmul.f32 0.125, %v3000_v61  ;;  %v3012_v32 = vmul.f32 0.125, %v2994_v62  ;;  %v3144_v59 = vrot.slane %v4244_v18, %v4274_v4 }
 0x522   :  { %v3019_v49 = vsub.f32 %v3643_v41, %v3011_v29  ;;  %v3014_v35 = vmul.f32 0.125, %v3006_v30  ;;  %v3186_v30 = vrot.slane %v4246_v19, %v4271_v2 }
 0x523   :  { %v3021_v36 = vsub.f32 %v3645_v6, %v3013_v31  ;;  %v3020_v33 = vsub.f32 %v3644_v7, %v3012_v32 }
 0x524   :  { %v3027_v37 = vmul.f32 %v3019_v49, %v3019_v49  ;;  %v3022_v1 = vsub.f32 %v3646_v11, %v3014_v35 }
 0x525   :  { %v3029_v38 = vmul.f32 %v3021_v36, %v3021_v36  ;;  %v3028_v43 = vmul.f32 %v3020_v33, %v3020_v33 }
 0x526   :  { %v3055_v46 = vrot.slane %v3027_v37, 4  ;;  %v3030_v47 = vmul.f32 %v3022_v1, %v3022_v1 }
 0x527   :  { %v3067_v42 = vrot.slane %v3029_v38, 4  ;;  %v3061_v51 = vrot.slane %v3028_v43, 4 }
 0x528   :  { %v3056_v34 = vadd.f32 %v3055_v46, %v3027_v37  ;;  %v3073_v55 = vrot.slane %v3030_v47, 4 }
 0x529   :  { %v3068_v3 = vadd.f32 %v3067_v42, %v3029_v38  ;;  %v3062_v39 = vadd.f32 %v3061_v51, %v3028_v43 }
 0x52a   :  { %v3057_v8 = vrot.slane %v3056_v34, 2  ;;  %v3074_v50 = vadd.f32 %v3073_v55, %v3030_v47 }
 0x52b   :  { %v3069_v40 = vrot.slane %v3068_v3, 2  ;;  %v3063_v5 = vrot.slane %v3062_v39, 2 }
 0x52c   :  { %v3058_v41 = vadd.f32 %v3057_v8, %v3056_v34  ;;  %v3075_v52 = vrot.slane %v3074_v50, 2 }
 0x52d   :  { %v3070_v63 = vadd.f32 %v3069_v40, %v3068_v3  ;;  %v3064_v6 = vadd.f32 %v3063_v5, %v3062_v39 }
 0x52e   :  { %v3059_v7 = vrot.slane %v3058_v41, 1  ;;  %v3076_v48 = vadd.f32 %v3075_v52, %v3074_v50 }
 0x52f   :  { %v3071_v10 = vrot.slane %v3070_v63, 1  ;;  %v3065_v53 = vrot.slane %v3064_v6, 1 }
 0x530   :  { %v3060_v11 = vadd.f32 %v3059_v7, %v3058_v41  ;;  %v3077_v13 = vrot.slane %v3076_v48, 1 }
 0x531   :  { %v3072_v12 = vadd.f32 %v3071_v10, %v3070_v63  ;;  %v3066_v44 = vadd.f32 %v3065_v53, %v3064_v6 }
 0x532   :  { %v3083_v54 = vmul.f32 0.125, %v3060_v11  ;;  %v3078_v45 = vadd.f32 %v3077_v13, %v3076_v48 }
 0x533   :  { %v3085_v9 = vmul.f32 0.125, %v3072_v12  ;;  %v3084_v14 = vmul.f32 0.125, %v3066_v44 }
 0x534   :  { %v3091_v20 = vadd.f32 0.8, %v3083_v54  ;;  %v3086_v15 = vmul.f32 0.125, %v3078_v45 }
 0x535   :  { %v3093_v0 = vadd.f32 0.8, %v3085_v9  ;;  %v3092_v16 = vadd.f32 0.8, %v3084_v14 }
 0x536   :  { %3820 = vrsqrt.f32 %v3091_v20  ;;  %v3094_v17 = vadd.f32 0.8, %v3086_v15 }
 0x537   :  { %3822 = vrsqrt.f32 %v3093_v0 }
 0x538   :  { %3824 = vrsqrt.f32 %v3092_v16 }
 0x539   :  { %3826 = vrsqrt.f32 %v3094_v17 }
 0x540   :  { %v3821_v22 = vpop.eup %3820 }
 0x541   :  { %v3823_v24 = vpop.eup %3822  ;;  %v3107_v25 = vmul.f32 %v3821_v22, %v3019_v49 }
 0x542   :  { %v3825_v28 = vpop.eup %3824  ;;  %v3109_v57 = vmul.f32 %v3823_v24, %v3021_v36 }
 0x543   :  { %v3827_v61 = vpop.eup %3826  ;;  %v3157_v62 = vmul.f32 %v3132_v21, %v3107_v25  ;;  %v3108_v29 = vmul.f32 %v3825_v28, %v3020_v33 }
 0x544   :  { %v3159_v31 = vmul.f32 %v3140_v23, %v3109_v57  ;;  %v3110_v32 = vmul.f32 %v3827_v61, %v3022_v1 }
 0x545   :  { %v3207_v49 = vadd.f32 %v3182_v26, %v3157_v62  ;;  %v3158_v35 = vmul.f32 %v3136_v27, %v3108_v29 }
 0x546   :  { %v3209_v36 = vadd.f32 %v3190_v58, %v3159_v31  ;;  %v3160_v37 = vmul.f32 %v3144_v59, %v3110_v32 }
 0x547   :  { %vm3215_vm13 = vcmp.gt.f32.partialorder %v3207_v49, 0.0  ;;  %v3223_v60 = vmul.f32 0.2, %v3207_v49  ;;  %v3208_v38 = vadd.f32 %v3186_v30, %v3158_v35 }
 0x548   :  { %vm3217_vm14 = vcmp.gt.f32.partialorder %v3209_v36, 0.0  ;;  %v3225_v18 = vmul.f32 0.2, %v3209_v36  ;;  %v3210_v43 = vadd.f32 %v3194_v56, %v3160_v37 }
 0x549   :  { %v3231_v33 = vsel %vm3215_vm13, %v3207_v49, %v3223_v60  ;;  %vm3216_vm15 = vcmp.gt.f32.partialorder %v3208_v38, 0.0  ;;  %v3224_v2 = vmul.f32 0.2, %v3208_v38 }
 0x54a   :  { %3239 = vst [vmem:[#allocation13 + $0x20] sm:$0xff] %v3231_v33  ;;  %v3233_v1 = vsel %vm3217_vm14, %v3209_v36, %v3225_v18  ;;  %vm3218_vm0 = vcmp.gt.f32.partialorder %v3210_v43, 0.0  ;;  %v3226_v46 = vmul.f32 0.2, %v3210_v43 }
 0x54b   :  { %3241 = vst [vmem:[#allocation13 + $0x30] sm:$0xff] %v3233_v1  ;;  %v3232_v19 = vsel %vm3216_vm15, %v3208_v38, %v3224_v2 }
 0x54c   :  { %3240 = vst [vmem:[#allocation13 + $0x28] sm:$0xff] %v3232_v19  ;;  %v3234_v4 = vsel %vm3218_vm0, %v3210_v43, %v3226_v46 }
 0x54d   :  { %3242 = vst [vmem:[#allocation13 + $0x38] sm:$0xff] %v3234_v4 }
 0x54e   :  { %3971 = shalt.err (!%p3968_p10)
}
 0x54f   :  { %s3972_s25 = scalar_lea.hbm %s4318_s6, 1024 }
 0x550   :  { %p3973_p11 = scmp.ne.s32.totalorder %s4318_s6, %s3972_s25  ;;  %p3976_p12 = scmp.lt.u32.totalorder %s3972_s25, %s4318_s6 }
 0x552   :  { %p3978_p13 = pnand %p3976_p12, %p3973_p11 }
 0x554   :  { %3981 = shalt.err (!%p3978_p13)
}
 0x555   :  { %3252 = dma.vmem_to_hbm [thread:$0]  %s3250_s0, 1024, %s4318_s6, [#allocation4]  }
 0x556   :  { %3990 = dma.done.wait [#allocation4], 1024  }
 0x557   :  { %3991 = vsyncadd [#allocation4], 4294966272 }
 0x558   :  { %3256 = vsyncpa [#allocation3], 1 }
 0x559   :  { %3257 = vsyncpa [#allocation6], 1 }
 0x55a   :  { %3258 = vsyncpa [#allocation9], 1 }
 0x55b   :  { %3259 = vsyncpa [#allocation12], 1 }
 0x55c   :  { %3260 = vsyncpa [#allocation4], 1 }

</bundles_post_ra>
